<compile_context>
chip_gen: v6e
topology: v6e:2x2x1
jax: 0.10.0
libtpu: 0.0.40
codegen_flags: <defaults>
</compile_context>

<pallas_src>
import functools

import jax
import jax.numpy as jnp
import numpy as np
from jax import lax
from jax.experimental import pallas as pl
from jax.experimental.pallas import tpu as pltpu


# ----------------------------------------------------------------------------
# Fused forward kernel
# ----------------------------------------------------------------------------

def _fused_model_kernel(
    # --- SMEM inputs ---------------------------------------------------------
    alphas_ref,        # (3,)  f32 : PReLU alphas (sparsify, mlp1, mlp2)
    src_ref,           # (E,)  i32 : edge source node index
    dst_ref,           # (E,)  i32 : edge destination node index
    batch_ref,         # (N,)  i32 : node -> graph index
    # --- VMEM inputs ---------------------------------------------------------
    x_ref, e_ref,
    pn_w_ref, pn_b_ref, pe_w_ref, pe_b_ref,
    g_w1_ref, g_b1_ref, g_w2_ref, g_b2_ref,
    sp_w_ref, sp_b_ref,
    m1_w_ref, m1_b_ref, m2_w_ref, m2_b_ref, m3_w_ref, m3_b_ref,
    # --- output --------------------------------------------------------------
    out_ref,           # (G, 128) f32, lane-dense padded
    # --- VMEM scratch --------------------------------------------------------
    node_scr,          # (N, H) f32
    edge_scr,          # (E, H) f32
    agg_scr,           # (N, H) f32
    pool_scr,          # (G, H) f32
    *, depth, n_edges, n_nodes):

    def mxu(a, b):
        # bf16 MXU operands, f32 accumulation (valid on v5e / v6e / v7x).
        return jnp.dot(a.astype(jnp.bfloat16), b.astype(jnp.bfloat16),
                       preferred_element_type=jnp.float32)

    # --- GNN.project_node_feats : Linear + ReLU (f32, K=node_in is tiny) ------
    node_scr[...] = jnp.maximum(
        jnp.dot(x_ref[...], pn_w_ref[...], preferred_element_type=jnp.float32)
        + pn_b_ref[...], 0.0)                                          # (N, H)
    # --- GNN.project_edge_feats : Linear (f32) --------------------------------
    edge_scr[...] = (
        jnp.dot(e_ref[...], pe_w_ref[...], preferred_element_type=jnp.float32)
        + pe_b_ref[...])                                               # (E, H)

    # --- GINEConv stack --------------------------------------------------------
    # depth is small (3) -> static Python unroll is fine; switch to
    # lax.fori_loop with dynamic g_w*_ref[i] indexing if depth grows past ~4.
    for i in range(depth):
        agg_scr[...] = jnp.zeros_like(agg_scr)

        # Index-based gather + message + scatter-add (O(E*H), no E x N one-hots).
        def edge_body(e, carry):
            s = src_ref[e]
            d = dst_ref[e]
            msg = jnp.maximum(
                node_scr[pl.ds(s, 1), :] + edge_scr[pl.ds(e, 1), :], 0.0)
            agg_scr[pl.ds(d, 1), :] = agg_scr[pl.ds(d, 1), :] + msg
            return carry
        lax.fori_loop(0, n_edges, edge_body, 0)

        h = node_scr[...] + agg_scr[...]                       # eps = 0
        h = jnp.maximum(mxu(h, g_w1_ref[i]) + g_b1_ref[i], 0.0)   # nn: Linear+ReLU
        h = mxu(h, g_w2_ref[i]) + g_b2_ref[i]                     # nn: Linear
        if i < depth - 1:                                          # inter-layer ReLU
            h = jnp.maximum(h, 0.0)
        node_scr[...] = h                                          # dropout: identity

    # --- global_add_pool via index scatter-add ---------------------------------
    pool_scr[...] = jnp.zeros_like(pool_scr)

    def pool_body(n, carry):
        g = batch_ref[n]
        pool_scr[pl.ds(g, 1), :] = (pool_scr[pl.ds(g, 1), :]
                                    + node_scr[pl.ds(n, 1), :])
        return carry
    lax.fori_loop(0, n_nodes, pool_body, 0)

    # --- sparsify : Linear + PReLU ---------------------------------------------
    y = mxu(pool_scr[...], sp_w_ref[...]) + sp_b_ref[...]      # (G, R)
    readout = jnp.where(y > 0, y, y * alphas_ref[0])

    # --- predict MLP : Linear + PReLU + Linear + PReLU + Linear ----------------
    h = mxu(readout, m1_w_ref[...]) + m1_b_ref[...]
    h = jnp.where(h > 0, h, h * alphas_ref[1])                 # dropout: identity
    h = mxu(h, m2_w_ref[...]) + m2_b_ref[...]
    h = jnp.where(h > 0, h, h * alphas_ref[2])                 # dropout: identity
    out_ref[...] = mxu(h, m3_w_ref[...]) + m3_b_ref[...]       # (G, 128) lane-dense


_VMEM = pl.BlockSpec(memory_space=pltpu.MemorySpace.VMEM)
_SMEM = pl.BlockSpec(memory_space=pltpu.MemorySpace.SMEM)


def model_forward(params, x, edge_attr, src, dst, batch, *,
                  depth, n_graphs, out_dim):
    n_nodes = x.shape[0]
    n_edges = edge_attr.shape[0]
    node_hid = params["proj_node_w"].shape[1]
    readout_feats = params["sparsify_w"].shape[1]
    mlp_hidden = params["mlp1_w"].shape[1]
    out_pad = params["mlp3_w"].shape[1]      # 128 (lane-dense padded)

    # Advisory cost estimate so XLA schedules well around the custom call.
    flops = (2 * n_nodes * x.shape[1] * node_hid
             + 2 * n_edges * edge_attr.shape[1] * node_hid
             + depth * (4 * n_nodes * node_hid * node_hid + 4 * n_edges * node_hid)
             + 2 * n_graphs * node_hid * readout_feats
             + 2 * n_graphs * readout_feats * mlp_hidden
             + 2 * n_graphs * mlp_hidden * mlp_hidden
             + 2 * n_graphs * mlp_hidden * out_pad)
    leaves = jax.tree_util.tree_leaves((params, x, edge_attr, src, dst, batch))
    bytes_accessed = int(sum(int(np.prod(l.shape)) * l.dtype.itemsize
                             for l in leaves)) + n_graphs * out_pad * 4

    kernel = functools.partial(_fused_model_kernel, depth=depth,
                               n_edges=n_edges, n_nodes=n_nodes)
    out = pl.pallas_call(
        kernel,
        out_shape=jax.ShapeDtypeStruct((n_graphs, out_pad), jnp.float32),
        in_specs=[_SMEM] * 4 + [_VMEM] * 18,
        out_specs=_VMEM,
        scratch_shapes=[
            pltpu.VMEM((n_nodes, node_hid), jnp.float32),    # node_scr
            pltpu.VMEM((n_edges, node_hid), jnp.float32),    # edge_scr
            pltpu.VMEM((n_nodes, node_hid), jnp.float32),    # agg_scr
            pltpu.VMEM((n_graphs, node_hid), jnp.float32),   # pool_scr
        ],
        compiler_params=pltpu.CompilerParams(
            vmem_limit_bytes=32 * 1024 * 1024),
        cost_estimate=pl.CostEstimate(flops=int(flops), transcendentals=0,
                                      bytes_accessed=bytes_accessed),
    )(params["alphas"], src, dst, batch,
      x, edge_attr,
      params["proj_node_w"], params["proj_node_b"],
      params["proj_edge_w"], params["proj_edge_b"],
      params["gine_w1"], params["gine_b1"], params["gine_w2"], params["gine_b2"],
      params["sparsify_w"], params["sparsify_b"],
      params["mlp1_w"], params["mlp1_b"],
      params["mlp2_w"], params["mlp2_b"],
      params["mlp3_w"], params["mlp3_b"])
    return out[:, :out_dim]


# ----------------------------------------------------------------------------
# Parameter init (PyTorch-style uniform)
# ----------------------------------------------------------------------------

def _uniform_linear(key, fan_in, fan_out, w_dtype):
    kw, kb = jax.random.split(key)
    bound = 1.0 / np.sqrt(fan_in)
    w = jax.random.uniform(kw, (fan_in, fan_out), jnp.float32, -bound, bound)
    b = jax.random.uniform(kb, (1, fan_out), jnp.float32, -bound, bound)
    return w.astype(w_dtype), b


def init_model_params(key, node_in, edge_in, depth, node_hid,
                      readout_feats, mlp_hidden, out_dim, out_pad=128):
    keys = jax.random.split(key, 2 * depth + 6)
    p = {}
    # Input projections kept in f32 (tiny K, tighter numerics).
    p["proj_node_w"], p["proj_node_b"] = _uniform_linear(keys[0], node_in,
                                                         node_hid, jnp.float32)
    p["proj_edge_w"], p["proj_edge_b"] = _uniform_linear(keys[1], edge_in,
                                                         node_hid, jnp.float32)
    w1s, b1s, w2s, b2s = [], [], [], []
    for i in range(depth):
        w1, b1 = _uniform_linear(keys[2 + 2 * i], node_hid, node_hid, jnp.bfloat16)
        w2, b2 = _uniform_linear(keys[3 + 2 * i], node_hid, node_hid, jnp.bfloat16)
        w1s.append(w1); b1s.append(b1); w2s.append(w2); b2s.append(b2)
    p["gine_w1"] = jnp.stack(w1s)    # (depth, H, H) bf16
    p["gine_b1"] = jnp.stack(b1s)    # (depth, 1, H) f32
    p["gine_w2"] = jnp.stack(w2s)
    p["gine_b2"] = jnp.stack(b2s)
    k = 2 + 2 * depth
    p["sparsify_w"], p["sparsify_b"] = _uniform_linear(keys[k], node_hid,
                                                       readout_feats, jnp.bfloat16)
    p["mlp1_w"], p["mlp1_b"] = _uniform_linear(keys[k + 1], readout_feats,
                                               mlp_hidden, jnp.bfloat16)
    p["mlp2_w"], p["mlp2_b"] = _uniform_linear(keys[k + 2], mlp_hidden,
                                               mlp_hidden, jnp.bfloat16)
    w3, b3 = _uniform_linear(keys[k + 3], mlp_hidden, out_dim, jnp.float32)
    # Lane-dense zero-padding of the final Linear to 128 output columns.
    p["mlp3_w"] = jnp.zeros((mlp_hidden, out_pad), jnp.bfloat16
                            ).at[:, :out_dim].set(w3.astype(jnp.bfloat16))
    p["mlp3_b"] = jnp.zeros((1, out_pad), jnp.float32).at[:, :out_dim].set(b3)
    # PReLU alphas: sparsify, mlp1, mlp2 (PyTorch default init 0.25).
    p["alphas"] = jnp.full((3,), 0.25, jnp.float32)
    return p


# ----------------------------------------------------------------------------
# Pure-JAX f32 reference for a tolerance check
# ----------------------------------------------------------------------------

def reference_forward(params, x, edge_attr, src, dst, batch, n_graphs, depth,
                      out_dim):
    f32 = jnp.float32

    def lin(h, w, b):
        return jnp.dot(h, w.astype(f32)) + b

    def prelu(v, a):
        return jnp.where(v > 0, v, v * a)

    node = jax.nn.relu(lin(x, params["proj_node_w"], params["proj_node_b"]))
    edge = lin(edge_attr, params["proj_edge_w"], params["proj_edge_b"])
    n_nodes = x.shape[0]
    for i in range(depth):
        msg = jax.nn.relu(node[src] + edge)
        agg = jax.ops.segment_sum(msg, dst, num_segments=n_nodes)
        h = node + agg
        h = jax.nn.relu(lin(h, params["gine_w1"][i], params["gine_b1"][i]))
        h = lin(h, params["gine_w2"][i], params["gine_b2"][i])
        if i < depth - 1:
            h = jax.nn.relu(h)
        node = h
    readout = jax.ops.segment_sum(node, batch, num_segments=n_graphs)
    readout = prelu(lin(readout, params["sparsify_w"], params["sparsify_b"]),
                    params["alphas"][0])
    h = prelu(lin(readout, params["mlp1_w"], params["mlp1_b"]), params["alphas"][1])
    h = prelu(lin(h, params["mlp2_w"], params["mlp2_b"]), params["alphas"][2])
    return lin(h, params["mlp3_w"][:, :out_dim], params["mlp3_b"][:, :out_dim])


# ----------------------------------------------------------------------------
# Demo
# ----------------------------------------------------------------------------

if __name__ == "__main__":
    # Lane-aligned hyperparameters (structurally identical to the PyTorch module;
    # hidden dims chosen as multiples of 128 for the MXU).
    NODE_IN_FEATS = 16
    EDGE_IN_FEATS = 8
    GNN_DEPTH = 3
    NODE_HID = 128
    READOUT_FEATS = 128
    MLP_HIDDEN = 128
    OUT_DIM = 1

    # Batched so node-level matmuls have M = 128 rows (MXU occupancy),
    # while staying small overall.
    N_GRAPHS = 8
    NODES_PER_GRAPH = 16
    EDGES_PER_GRAPH = 32
    N_NODES = N_GRAPHS * NODES_PER_GRAPH      # 128
    N_EDGES = N_GRAPHS * EDGES_PER_GRAPH      # 256

    key = jax.random.PRNGKey(0)
    k_x, k_e, k_src, k_dst, k_params = jax.random.split(key, 5)

    x = jax.random.normal(k_x, (N_NODES, NODE_IN_FEATS), jnp.float32)
    edge_attr = jax.random.normal(k_e, (N_EDGES, EDGE_IN_FEATS), jnp.float32)

    # node -> graph assignment
    batch = jnp.repeat(jnp.arange(N_GRAPHS, dtype=jnp.int32), NODES_PER_GRAPH)

    # Random edges that stay within their own graph.
    src_local = jax.random.randint(k_src, (N_GRAPHS, EDGES_PER_GRAPH),
                                   0, NODES_PER_GRAPH)
    dst_local = jax.random.randint(k_dst, (N_GRAPHS, EDGES_PER_GRAPH),
                                   0, NODES_PER_GRAPH)
    offsets = (jnp.arange(N_GRAPHS, dtype=jnp.int32) * NODES_PER_GRAPH)[:, None]
    src = (src_local + offsets).reshape(-1).astype(jnp.int32)   # (E,)
    dst = (dst_local + offsets).reshape(-1).astype(jnp.int32)   # (E,)

    params = init_model_params(k_params, NODE_IN_FEATS, EDGE_IN_FEATS, GNN_DEPTH,
                               NODE_HID, READOUT_FEATS, MLP_HIDDEN, OUT_DIM)

    fwd = jax.jit(functools.partial(model_forward, depth=GNN_DEPTH,
                                    n_graphs=N_GRAPHS, out_dim=OUT_DIM))
    out = jax.block_until_ready(fwd(params, x, edge_attr, src, dst, batch))

    assert out.shape == (N_GRAPHS, OUT_DIM), out.shape
    assert out.dtype == jnp.float32
    assert bool(jnp.all(jnp.isfinite(out)))

    # Tolerance check vs. f32 reference (hidden weights are bf16 on the MXU with
    # f32 accumulation -> use a relative-L2 criterion).
    ref = reference_forward(params, x, edge_attr, src, dst, batch,
                            N_GRAPHS, GNN_DEPTH, OUT_DIM)
    out_np = np.asarray(out, np.float64)
    ref_np = np.asarray(ref, np.float64)
    rel_err = np.linalg.norm(out_np - ref_np) / (np.linalg.norm(ref_np) + 1e-6)
    assert rel_err < 5e-2, f"relative L2 error too high: {rel_err}"

    print("KERNEL_OK")
</pallas_src>

<mosaic_0001>
module attributes {stable_mosaic.version = 11 : i64} {
  func.func @_fused_model_kernel(%arg0: memref<3xf32, #tpu.memory_space<smem>>, %arg1: memref<256xi32, #tpu.memory_space<smem>>, %arg2: memref<256xi32, #tpu.memory_space<smem>>, %arg3: memref<128xi32, #tpu.memory_space<smem>>, %arg4: memref<128x16xf32, #tpu.memory_space<vmem>>, %arg5: memref<256x8xf32, #tpu.memory_space<vmem>>, %arg6: memref<16x128xf32, #tpu.memory_space<vmem>>, %arg7: memref<1x128xf32, #tpu.memory_space<vmem>>, %arg8: memref<8x128xf32, #tpu.memory_space<vmem>>, %arg9: memref<1x128xf32, #tpu.memory_space<vmem>>, %arg10: memref<3x128x128xbf16, #tpu.memory_space<vmem>>, %arg11: memref<3x1x128xf32, #tpu.memory_space<vmem>>, %arg12: memref<3x128x128xbf16, #tpu.memory_space<vmem>>, %arg13: memref<3x1x128xf32, #tpu.memory_space<vmem>>, %arg14: memref<128x128xbf16, #tpu.memory_space<vmem>>, %arg15: memref<1x128xf32, #tpu.memory_space<vmem>>, %arg16: memref<128x128xbf16, #tpu.memory_space<vmem>>, %arg17: memref<1x128xf32, #tpu.memory_space<vmem>>, %arg18: memref<128x128xbf16, #tpu.memory_space<vmem>>, %arg19: memref<1x128xf32, #tpu.memory_space<vmem>>, %arg20: memref<128x128xbf16, #tpu.memory_space<vmem>>, %arg21: memref<1x128xf32, #tpu.memory_space<vmem>>, %arg22: memref<8x128xf32, #tpu.memory_space<vmem>>, %arg23: memref<128x128xf32, #tpu.memory_space<vmem>>, %arg24: memref<256x128xf32, #tpu.memory_space<vmem>>, %arg25: memref<128x128xf32, #tpu.memory_space<vmem>>, %arg26: memref<8x128xf32, #tpu.memory_space<vmem>>) attributes {dimension_semantics = [], scalar_prefetch = 0 : i64, scratch_operands = 4 : i64, tpu.core_type = #tpu.core_type<tc>} {
    %c0 = arith.constant 0 : index
    %c0_0 = arith.constant 0 : index
    %0 = vector.load %arg4[%c0, %c0_0] : memref<128x16xf32, #tpu.memory_space<vmem>>, vector<128x16xf32>
    %c0_1 = arith.constant 0 : index
    %c0_2 = arith.constant 0 : index
    %1 = vector.load %arg6[%c0_1, %c0_2] : memref<16x128xf32, #tpu.memory_space<vmem>>, vector<16x128xf32>
    %cst = arith.constant dense<0.000000e+00> : vector<128x128xf32>
    %2 = tpu.matmul %0, %1, %cst {dimension_numbers = #tpu.dot_dimension_numbers<[1], [0], [0], [1], [0, 0, 1, 1], [], []>} : vector<128x16xf32>, vector<16x128xf32>, vector<128x128xf32> -> vector<128x128xf32>
    %c0_3 = arith.constant 0 : index
    %c0_4 = arith.constant 0 : index
    %3 = vector.load %arg7[%c0_3, %c0_4] : memref<1x128xf32, #tpu.memory_space<vmem>>, vector<1x128xf32>
    %4 = vector.broadcast %3 : vector<1x128xf32> to vector<128x128xf32>
    %5 = arith.addf %2, %4 : vector<128x128xf32>
    %cst_5 = arith.constant 0.000000e+00 : f32
    %6 = vector.broadcast %cst_5 : f32 to vector<128x128xf32>
    %7 = arith.maximumf %5, %6 : vector<128x128xf32>
    %c0_6 = arith.constant 0 : index
    %c0_7 = arith.constant 0 : index
    %8 = vector.load %arg23[%c0_6, %c0_7] : memref<128x128xf32, #tpu.memory_space<vmem>>, vector<128x128xf32>
    tpu.vector_store %arg23[%c0_6, %c0_7], %7 {strides = array<i32>} : memref<128x128xf32, #tpu.memory_space<vmem>>, vector<128x128xf32>,
    %c0_8 = arith.constant 0 : index
    %c0_9 = arith.constant 0 : index
    %9 = vector.load %arg5[%c0_8, %c0_9] : memref<256x8xf32, #tpu.memory_space<vmem>>, vector<256x8xf32>
    %c0_10 = arith.constant 0 : index
    %c0_11 = arith.constant 0 : index
    %10 = vector.load %arg8[%c0_10, %c0_11] : memref<8x128xf32, #tpu.memory_space<vmem>>, vector<8x128xf32>
    %cst_12 = arith.constant dense<0.000000e+00> : vector<256x128xf32>
    %11 = tpu.matmul %9, %10, %cst_12 {dimension_numbers = #tpu.dot_dimension_numbers<[1], [0], [0], [1], [0, 0, 1, 1], [], []>} : vector<256x8xf32>, vector<8x128xf32>, vector<256x128xf32> -> vector<256x128xf32>
    %c0_13 = arith.constant 0 : index
    %c0_14 = arith.constant 0 : index
    %12 = vector.load %arg9[%c0_13, %c0_14] : memref<1x128xf32, #tpu.memory_space<vmem>>, vector<1x128xf32>
    %13 = vector.broadcast %12 : vector<1x128xf32> to vector<256x128xf32>
    %14 = arith.addf %11, %13 : vector<256x128xf32>
    %c0_15 = arith.constant 0 : index
    %c0_16 = arith.constant 0 : index
    %15 = vector.load %arg24[%c0_15, %c0_16] : memref<256x128xf32, #tpu.memory_space<vmem>>, vector<256x128xf32>
    tpu.vector_store %arg24[%c0_15, %c0_16], %14 {strides = array<i32>} : memref<256x128xf32, #tpu.memory_space<vmem>>, vector<256x128xf32>,
    %cst_17 = arith.constant 0.000000e+00 : f32
    %16 = vector.broadcast %cst_17 : f32 to vector<128x128xf32>
    %c0_18 = arith.constant 0 : index
    %c0_19 = arith.constant 0 : index
    %17 = vector.load %arg25[%c0_18, %c0_19] : memref<128x128xf32, #tpu.memory_space<vmem>>, vector<128x128xf32>
    tpu.vector_store %arg25[%c0_18, %c0_19], %16 {strides = array<i32>} : memref<128x128xf32, #tpu.memory_space<vmem>>, vector<128x128xf32>,
    %c0_i32 = arith.constant 0 : i32
    %c256_i32 = arith.constant 256 : i32
    %18 = arith.addi %c0_i32, %c256_i32 : i32
    %c1_i32 = arith.constant 1 : i32
    scf.for %arg27 = %c0_i32 to %18 step %c1_i32  : i32 {
      %142 = arith.index_cast %arg27 : i32 to index
      %143 = memref.load %arg1[%142] : memref<256xi32, #tpu.memory_space<smem>>
      %144 = arith.index_cast %arg27 : i32 to index
      %145 = memref.load %arg2[%144] : memref<256xi32, #tpu.memory_space<smem>>
      %146 = arith.index_cast %143 : i32 to index
      %c0_134 = arith.constant 0 : index
      %147 = vector.load %arg23[%146, %c0_134] : memref<128x128xf32, #tpu.memory_space<vmem>>, vector<1x128xf32>
      %148 = arith.index_cast %arg27 : i32 to index
      %c0_135 = arith.constant 0 : index
      %149 = vector.load %arg24[%148, %c0_135] : memref<256x128xf32, #tpu.memory_space<vmem>>, vector<1x128xf32>
      %150 = arith.addf %147, %149 : vector<1x128xf32>
      %cst_136 = arith.constant 0.000000e+00 : f32
      %151 = vector.broadcast %cst_136 : f32 to vector<1x128xf32>
      %152 = arith.maximumf %150, %151 : vector<1x128xf32>
      %153 = arith.index_cast %145 : i32 to index
      %c0_137 = arith.constant 0 : index
      %154 = vector.load %arg25[%153, %c0_137] : memref<128x128xf32, #tpu.memory_space<vmem>>, vector<1x128xf32>
      %155 = arith.addf %154, %152 : vector<1x128xf32>
      %156 = arith.index_cast %145 : i32 to index
      %c0_138 = arith.constant 0 : index
      %157 = vector.load %arg25[%156, %c0_138] : memref<128x128xf32, #tpu.memory_space<vmem>>, vector<1x128xf32>
      tpu.vector_store %arg25[%156, %c0_138], %155 {strides = array<i32>} : memref<128x128xf32, #tpu.memory_space<vmem>>, vector<1x128xf32>,
    }
    %c256_i32_20 = arith.constant 256 : i32
    %c0_21 = arith.constant 0 : index
    %c0_22 = arith.constant 0 : index
    %19 = vector.load %arg23[%c0_21, %c0_22] : memref<128x128xf32, #tpu.memory_space<vmem>>, vector<128x128xf32>
    %c0_23 = arith.constant 0 : index
    %c0_24 = arith.constant 0 : index
    %20 = vector.load %arg25[%c0_23, %c0_24] : memref<128x128xf32, #tpu.memory_space<vmem>>, vector<128x128xf32>
    %21 = arith.addf %19, %20 : vector<128x128xf32>
    %c0_25 = arith.constant 0 : index
    %c0_26 = arith.constant 0 : index
    %c0_27 = arith.constant 0 : index
    %22 = vector.load %arg10[%c0_25, %c0_26, %c0_27] : memref<3x128x128xbf16, #tpu.memory_space<vmem>>, vector<1x128x128xbf16>
    %23 = vector.shape_cast %22 : vector<1x128x128xbf16> to vector<128x128xbf16>
    %24 = arith.truncf %21 : vector<128x128xf32> to vector<128x128xbf16>
    %cst_28 = arith.constant dense<0.000000e+00> : vector<128x128xf32>
    %25 = tpu.matmul %24, %23, %cst_28 {dimension_numbers = #tpu.dot_dimension_numbers<[1], [0], [0], [1], [0, 0, 1, 1], [], []>} : vector<128x128xbf16>, vector<128x128xbf16>, vector<128x128xf32> -> vector<128x128xf32>
    %c0_29 = arith.constant 0 : index
    %c0_30 = arith.constant 0 : index
    %c0_31 = arith.constant 0 : index
    %26 = vector.load %arg11[%c0_29, %c0_30, %c0_31] : memref<3x1x128xf32, #tpu.memory_space<vmem>>, vector<1x1x128xf32>
    %27 = vector.shape_cast %26 : vector<1x1x128xf32> to vector<1x128xf32>
    %28 = vector.broadcast %27 : vector<1x128xf32> to vector<128x128xf32>
    %29 = arith.addf %25, %28 : vector<128x128xf32>
    %cst_32 = arith.constant 0.000000e+00 : f32
    %30 = vector.broadcast %cst_32 : f32 to vector<128x128xf32>
    %31 = arith.maximumf %29, %30 : vector<128x128xf32>
    %c0_33 = arith.constant 0 : index
    %c0_34 = arith.constant 0 : index
    %c0_35 = arith.constant 0 : index
    %32 = vector.load %arg12[%c0_33, %c0_34, %c0_35] : memref<3x128x128xbf16, #tpu.memory_space<vmem>>, vector<1x128x128xbf16>
    %33 = vector.shape_cast %32 : vector<1x128x128xbf16> to vector<128x128xbf16>
    %34 = arith.truncf %31 : vector<128x128xf32> to vector<128x128xbf16>
    %cst_36 = arith.constant dense<0.000000e+00> : vector<128x128xf32>
    %35 = tpu.matmul %34, %33, %cst_36 {dimension_numbers = #tpu.dot_dimension_numbers<[1], [0], [0], [1], [0, 0, 1, 1], [], []>} : vector<128x128xbf16>, vector<128x128xbf16>, vector<128x128xf32> -> vector<128x128xf32>
    %c0_37 = arith.constant 0 : index
    %c0_38 = arith.constant 0 : index
    %c0_39 = arith.constant 0 : index
    %36 = vector.load %arg13[%c0_37, %c0_38, %c0_39] : memref<3x1x128xf32, #tpu.memory_space<vmem>>, vector<1x1x128xf32>
    %37 = vector.shape_cast %36 : vector<1x1x128xf32> to vector<1x128xf32>
    %38 = vector.broadcast %37 : vector<1x128xf32> to vector<128x128xf32>
    %39 = arith.addf %35, %38 : vector<128x128xf32>
    %cst_40 = arith.constant 0.000000e+00 : f32
    %40 = vector.broadcast %cst_40 : f32 to vector<128x128xf32>
    %41 = arith.maximumf %39, %40 : vector<128x128xf32>
    %c0_41 = arith.constant 0 : index
    %c0_42 = arith.constant 0 : index
    %42 = vector.load %arg23[%c0_41, %c0_42] : memref<128x128xf32, #tpu.memory_space<vmem>>, vector<128x128xf32>
    tpu.vector_store %arg23[%c0_41, %c0_42], %41 {strides = array<i32>} : memref<128x128xf32, #tpu.memory_space<vmem>>, vector<128x128xf32>,
    %cst_43 = arith.constant 0.000000e+00 : f32
    %43 = vector.broadcast %cst_43 : f32 to vector<128x128xf32>
    %c0_44 = arith.constant 0 : index
    %c0_45 = arith.constant 0 : index
    %44 = vector.load %arg25[%c0_44, %c0_45] : memref<128x128xf32, #tpu.memory_space<vmem>>, vector<128x128xf32>
    tpu.vector_store %arg25[%c0_44, %c0_45], %43 {strides = array<i32>} : memref<128x128xf32, #tpu.memory_space<vmem>>, vector<128x128xf32>,
    %c0_i32_46 = arith.constant 0 : i32
    %c256_i32_47 = arith.constant 256 : i32
    %45 = arith.addi %c0_i32_46, %c256_i32_47 : i32
    %c1_i32_48 = arith.constant 1 : i32
    scf.for %arg27 = %c0_i32_46 to %45 step %c1_i32_48  : i32 {
      %142 = arith.index_cast %arg27 : i32 to index
      %143 = memref.load %arg1[%142] : memref<256xi32, #tpu.memory_space<smem>>
      %144 = arith.index_cast %arg27 : i32 to index
      %145 = memref.load %arg2[%144] : memref<256xi32, #tpu.memory_space<smem>>
      %146 = arith.index_cast %143 : i32 to index
      %c0_134 = arith.constant 0 : index
      %147 = vector.load %arg23[%146, %c0_134] : memref<128x128xf32, #tpu.memory_space<vmem>>, vector<1x128xf32>
      %148 = arith.index_cast %arg27 : i32 to index
      %c0_135 = arith.constant 0 : index
      %149 = vector.load %arg24[%148, %c0_135] : memref<256x128xf32, #tpu.memory_space<vmem>>, vector<1x128xf32>
      %150 = arith.addf %147, %149 : vector<1x128xf32>
      %cst_136 = arith.constant 0.000000e+00 : f32
      %151 = vector.broadcast %cst_136 : f32 to vector<1x128xf32>
      %152 = arith.maximumf %150, %151 : vector<1x128xf32>
      %153 = arith.index_cast %145 : i32 to index
      %c0_137 = arith.constant 0 : index
      %154 = vector.load %arg25[%153, %c0_137] : memref<128x128xf32, #tpu.memory_space<vmem>>, vector<1x128xf32>
      %155 = arith.addf %154, %152 : vector<1x128xf32>
      %156 = arith.index_cast %145 : i32 to index
      %c0_138 = arith.constant 0 : index
      %157 = vector.load %arg25[%156, %c0_138] : memref<128x128xf32, #tpu.memory_space<vmem>>, vector<1x128xf32>
      tpu.vector_store %arg25[%156, %c0_138], %155 {strides = array<i32>} : memref<128x128xf32, #tpu.memory_space<vmem>>, vector<1x128xf32>,
    }
    %c256_i32_49 = arith.constant 256 : i32
    %c0_50 = arith.constant 0 : index
    %c0_51 = arith.constant 0 : index
    %46 = vector.load %arg23[%c0_50, %c0_51] : memref<128x128xf32, #tpu.memory_space<vmem>>, vector<128x128xf32>
    %c0_52 = arith.constant 0 : index
    %c0_53 = arith.constant 0 : index
    %47 = vector.load %arg25[%c0_52, %c0_53] : memref<128x128xf32, #tpu.memory_space<vmem>>, vector<128x128xf32>
    %48 = arith.addf %46, %47 : vector<128x128xf32>
    %c1 = arith.constant 1 : index
    %c0_54 = arith.constant 0 : index
    %c0_55 = arith.constant 0 : index
    %49 = vector.load %arg10[%c1, %c0_54, %c0_55] : memref<3x128x128xbf16, #tpu.memory_space<vmem>>, vector<1x128x128xbf16>
    %50 = vector.shape_cast %49 : vector<1x128x128xbf16> to vector<128x128xbf16>
    %51 = arith.truncf %48 : vector<128x128xf32> to vector<128x128xbf16>
    %cst_56 = arith.constant dense<0.000000e+00> : vector<128x128xf32>
    %52 = tpu.matmul %51, %50, %cst_56 {dimension_numbers = #tpu.dot_dimension_numbers<[1], [0], [0], [1], [0, 0, 1, 1], [], []>} : vector<128x128xbf16>, vector<128x128xbf16>, vector<128x128xf32> -> vector<128x128xf32>
    %c1_57 = arith.constant 1 : index
    %c0_58 = arith.constant 0 : index
    %c0_59 = arith.constant 0 : index
    %53 = vector.load %arg11[%c1_57, %c0_58, %c0_59] : memref<3x1x128xf32, #tpu.memory_space<vmem>>, vector<1x1x128xf32>
    %54 = vector.shape_cast %53 : vector<1x1x128xf32> to vector<1x128xf32>
    %55 = vector.broadcast %54 : vector<1x128xf32> to vector<128x128xf32>
    %56 = arith.addf %52, %55 : vector<128x128xf32>
    %cst_60 = arith.constant 0.000000e+00 : f32
    %57 = vector.broadcast %cst_60 : f32 to vector<128x128xf32>
    %58 = arith.maximumf %56, %57 : vector<128x128xf32>
    %c1_61 = arith.constant 1 : index
    %c0_62 = arith.constant 0 : index
    %c0_63 = arith.constant 0 : index
    %59 = vector.load %arg12[%c1_61, %c0_62, %c0_63] : memref<3x128x128xbf16, #tpu.memory_space<vmem>>, vector<1x128x128xbf16>
    %60 = vector.shape_cast %59 : vector<1x128x128xbf16> to vector<128x128xbf16>
    %61 = arith.truncf %58 : vector<128x128xf32> to vector<128x128xbf16>
    %cst_64 = arith.constant dense<0.000000e+00> : vector<128x128xf32>
    %62 = tpu.matmul %61, %60, %cst_64 {dimension_numbers = #tpu.dot_dimension_numbers<[1], [0], [0], [1], [0, 0, 1, 1], [], []>} : vector<128x128xbf16>, vector<128x128xbf16>, vector<128x128xf32> -> vector<128x128xf32>
    %c1_65 = arith.constant 1 : index
    %c0_66 = arith.constant 0 : index
    %c0_67 = arith.constant 0 : index
    %63 = vector.load %arg13[%c1_65, %c0_66, %c0_67] : memref<3x1x128xf32, #tpu.memory_space<vmem>>, vector<1x1x128xf32>
    %64 = vector.shape_cast %63 : vector<1x1x128xf32> to vector<1x128xf32>
    %65 = vector.broadcast %64 : vector<1x128xf32> to vector<128x128xf32>
    %66 = arith.addf %62, %65 : vector<128x128xf32>
    %cst_68 = arith.constant 0.000000e+00 : f32
    %67 = vector.broadcast %cst_68 : f32 to vector<128x128xf32>
    %68 = arith.maximumf %66, %67 : vector<128x128xf32>
    %c0_69 = arith.constant 0 : index
    %c0_70 = arith.constant 0 : index
    %69 = vector.load %arg23[%c0_69, %c0_70] : memref<128x128xf32, #tpu.memory_space<vmem>>, vector<128x128xf32>
    tpu.vector_store %arg23[%c0_69, %c0_70], %68 {strides = array<i32>} : memref<128x128xf32, #tpu.memory_space<vmem>>, vector<128x128xf32>,
    %cst_71 = arith.constant 0.000000e+00 : f32
    %70 = vector.broadcast %cst_71 : f32 to vector<128x128xf32>
    %c0_72 = arith.constant 0 : index
    %c0_73 = arith.constant 0 : index
    %71 = vector.load %arg25[%c0_72, %c0_73] : memref<128x128xf32, #tpu.memory_space<vmem>>, vector<128x128xf32>
    tpu.vector_store %arg25[%c0_72, %c0_73], %70 {strides = array<i32>} : memref<128x128xf32, #tpu.memory_space<vmem>>, vector<128x128xf32>,
    %c0_i32_74 = arith.constant 0 : i32
    %c256_i32_75 = arith.constant 256 : i32
    %72 = arith.addi %c0_i32_74, %c256_i32_75 : i32
    %c1_i32_76 = arith.constant 1 : i32
    scf.for %arg27 = %c0_i32_74 to %72 step %c1_i32_76  : i32 {
      %142 = arith.index_cast %arg27 : i32 to index
      %143 = memref.load %arg1[%142] : memref<256xi32, #tpu.memory_space<smem>>
      %144 = arith.index_cast %arg27 : i32 to index
      %145 = memref.load %arg2[%144] : memref<256xi32, #tpu.memory_space<smem>>
      %146 = arith.index_cast %143 : i32 to index
      %c0_134 = arith.constant 0 : index
      %147 = vector.load %arg23[%146, %c0_134] : memref<128x128xf32, #tpu.memory_space<vmem>>, vector<1x128xf32>
      %148 = arith.index_cast %arg27 : i32 to index
      %c0_135 = arith.constant 0 : index
      %149 = vector.load %arg24[%148, %c0_135] : memref<256x128xf32, #tpu.memory_space<vmem>>, vector<1x128xf32>
      %150 = arith.addf %147, %149 : vector<1x128xf32>
      %cst_136 = arith.constant 0.000000e+00 : f32
      %151 = vector.broadcast %cst_136 : f32 to vector<1x128xf32>
      %152 = arith.maximumf %150, %151 : vector<1x128xf32>
      %153 = arith.index_cast %145 : i32 to index
      %c0_137 = arith.constant 0 : index
      %154 = vector.load %arg25[%153, %c0_137] : memref<128x128xf32, #tpu.memory_space<vmem>>, vector<1x128xf32>
      %155 = arith.addf %154, %152 : vector<1x128xf32>
      %156 = arith.index_cast %145 : i32 to index
      %c0_138 = arith.constant 0 : index
      %157 = vector.load %arg25[%156, %c0_138] : memref<128x128xf32, #tpu.memory_space<vmem>>, vector<1x128xf32>
      tpu.vector_store %arg25[%156, %c0_138], %155 {strides = array<i32>} : memref<128x128xf32, #tpu.memory_space<vmem>>, vector<1x128xf32>,
    }
    %c256_i32_77 = arith.constant 256 : i32
    %c0_78 = arith.constant 0 : index
    %c0_79 = arith.constant 0 : index
    %73 = vector.load %arg23[%c0_78, %c0_79] : memref<128x128xf32, #tpu.memory_space<vmem>>, vector<128x128xf32>
    %c0_80 = arith.constant 0 : index
    %c0_81 = arith.constant 0 : index
    %74 = vector.load %arg25[%c0_80, %c0_81] : memref<128x128xf32, #tpu.memory_space<vmem>>, vector<128x128xf32>
    %75 = arith.addf %73, %74 : vector<128x128xf32>
    %c2 = arith.constant 2 : index
    %c0_82 = arith.constant 0 : index
    %c0_83 = arith.constant 0 : index
    %76 = vector.load %arg10[%c2, %c0_82, %c0_83] : memref<3x128x128xbf16, #tpu.memory_space<vmem>>, vector<1x128x128xbf16>
    %77 = vector.shape_cast %76 : vector<1x128x128xbf16> to vector<128x128xbf16>
    %78 = arith.truncf %75 : vector<128x128xf32> to vector<128x128xbf16>
    %cst_84 = arith.constant dense<0.000000e+00> : vector<128x128xf32>
    %79 = tpu.matmul %78, %77, %cst_84 {dimension_numbers = #tpu.dot_dimension_numbers<[1], [0], [0], [1], [0, 0, 1, 1], [], []>} : vector<128x128xbf16>, vector<128x128xbf16>, vector<128x128xf32> -> vector<128x128xf32>
    %c2_85 = arith.constant 2 : index
    %c0_86 = arith.constant 0 : index
    %c0_87 = arith.constant 0 : index
    %80 = vector.load %arg11[%c2_85, %c0_86, %c0_87] : memref<3x1x128xf32, #tpu.memory_space<vmem>>, vector<1x1x128xf32>
    %81 = vector.shape_cast %80 : vector<1x1x128xf32> to vector<1x128xf32>
    %82 = vector.broadcast %81 : vector<1x128xf32> to vector<128x128xf32>
    %83 = arith.addf %79, %82 : vector<128x128xf32>
    %cst_88 = arith.constant 0.000000e+00 : f32
    %84 = vector.broadcast %cst_88 : f32 to vector<128x128xf32>
    %85 = arith.maximumf %83, %84 : vector<128x128xf32>
    %c2_89 = arith.constant 2 : index
    %c0_90 = arith.constant 0 : index
    %c0_91 = arith.constant 0 : index
    %86 = vector.load %arg12[%c2_89, %c0_90, %c0_91] : memref<3x128x128xbf16, #tpu.memory_space<vmem>>, vector<1x128x128xbf16>
    %87 = vector.shape_cast %86 : vector<1x128x128xbf16> to vector<128x128xbf16>
    %88 = arith.truncf %85 : vector<128x128xf32> to vector<128x128xbf16>
    %cst_92 = arith.constant dense<0.000000e+00> : vector<128x128xf32>
    %89 = tpu.matmul %88, %87, %cst_92 {dimension_numbers = #tpu.dot_dimension_numbers<[1], [0], [0], [1], [0, 0, 1, 1], [], []>} : vector<128x128xbf16>, vector<128x128xbf16>, vector<128x128xf32> -> vector<128x128xf32>
    %c2_93 = arith.constant 2 : index
    %c0_94 = arith.constant 0 : index
    %c0_95 = arith.constant 0 : index
    %90 = vector.load %arg13[%c2_93, %c0_94, %c0_95] : memref<3x1x128xf32, #tpu.memory_space<vmem>>, vector<1x1x128xf32>
    %91 = vector.shape_cast %90 : vector<1x1x128xf32> to vector<1x128xf32>
    %92 = vector.broadcast %91 : vector<1x128xf32> to vector<128x128xf32>
    %93 = arith.addf %89, %92 : vector<128x128xf32>
    %c0_96 = arith.constant 0 : index
    %c0_97 = arith.constant 0 : index
    %94 = vector.load %arg23[%c0_96, %c0_97] : memref<128x128xf32, #tpu.memory_space<vmem>>, vector<128x128xf32>
    tpu.vector_store %arg23[%c0_96, %c0_97], %93 {strides = array<i32>} : memref<128x128xf32, #tpu.memory_space<vmem>>, vector<128x128xf32>,
    %cst_98 = arith.constant 0.000000e+00 : f32
    %95 = vector.broadcast %cst_98 : f32 to vector<8x128xf32>
    %c0_99 = arith.constant 0 : index
    %c0_100 = arith.constant 0 : index
    %96 = vector.load %arg26[%c0_99, %c0_100] : memref<8x128xf32, #tpu.memory_space<vmem>>, vector<8x128xf32>
    tpu.vector_store %arg26[%c0_99, %c0_100], %95 {strides = array<i32>} : memref<8x128xf32, #tpu.memory_space<vmem>>, vector<8x128xf32>,
    %c0_i32_101 = arith.constant 0 : i32
    %c128_i32 = arith.constant 128 : i32
    %97 = arith.addi %c0_i32_101, %c128_i32 : i32
    %c1_i32_102 = arith.constant 1 : i32
    scf.for %arg27 = %c0_i32_101 to %97 step %c1_i32_102  : i32 {
      %142 = arith.index_cast %arg27 : i32 to index
      %143 = memref.load %arg3[%142] : memref<128xi32, #tpu.memory_space<smem>>
      %144 = arith.index_cast %143 : i32 to index
      %c0_134 = arith.constant 0 : index
      %145 = vector.load %arg26[%144, %c0_134] : memref<8x128xf32, #tpu.memory_space<vmem>>, vector<1x128xf32>
      %146 = arith.index_cast %arg27 : i32 to index
      %c0_135 = arith.constant 0 : index
      %147 = vector.load %arg23[%146, %c0_135] : memref<128x128xf32, #tpu.memory_space<vmem>>, vector<1x128xf32>
      %148 = arith.addf %145, %147 : vector<1x128xf32>
      %149 = arith.index_cast %143 : i32 to index
      %c0_136 = arith.constant 0 : index
      %150 = vector.load %arg26[%149, %c0_136] : memref<8x128xf32, #tpu.memory_space<vmem>>, vector<1x128xf32>
      tpu.vector_store %arg26[%149, %c0_136], %148 {strides = array<i32>} : memref<8x128xf32, #tpu.memory_space<vmem>>, vector<1x128xf32>,
    }
    %c128_i32_103 = arith.constant 128 : i32
    %c0_104 = arith.constant 0 : index
    %c0_105 = arith.constant 0 : index
    %98 = vector.load %arg26[%c0_104, %c0_105] : memref<8x128xf32, #tpu.memory_space<vmem>>, vector<8x128xf32>
    %c0_106 = arith.constant 0 : index
    %c0_107 = arith.constant 0 : index
    %99 = vector.load %arg14[%c0_106, %c0_107] : memref<128x128xbf16, #tpu.memory_space<vmem>>, vector<128x128xbf16>
    %100 = arith.truncf %98 : vector<8x128xf32> to vector<8x128xbf16>
    %cst_108 = arith.constant dense<0.000000e+00> : vector<8x128xf32>
    %101 = tpu.matmul %100, %99, %cst_108 {dimension_numbers = #tpu.dot_dimension_numbers<[1], [0], [0], [1], [0, 0, 1, 1], [], []>} : vector<8x128xbf16>, vector<128x128xbf16>, vector<8x128xf32> -> vector<8x128xf32>
    %c0_109 = arith.constant 0 : index
    %c0_110 = arith.constant 0 : index
    %102 = vector.load %arg15[%c0_109, %c0_110] : memref<1x128xf32, #tpu.memory_space<vmem>>, vector<1x128xf32>
    %103 = vector.broadcast %102 : vector<1x128xf32> to vector<8x128xf32>
    %104 = arith.addf %101, %103 : vector<8x128xf32>
    %cst_111 = arith.constant 0.000000e+00 : f32
    %105 = vector.broadcast %cst_111 : f32 to vector<8x128xf32>
    %106 = arith.cmpf ogt, %104, %105 : vector<8x128xf32>
    %c0_112 = arith.constant 0 : index
    %107 = memref.load %arg0[%c0_112] : memref<3xf32, #tpu.memory_space<smem>>
    %108 = vector.broadcast %107 : f32 to vector<8x128xf32>
    %109 = arith.mulf %104, %108 : vector<8x128xf32>
    %110 = arith.select %106, %104, %109 : vector<8x128xi1>, vector<8x128xf32>
    %c0_113 = arith.constant 0 : index
    %c0_114 = arith.constant 0 : index
    %111 = vector.load %arg16[%c0_113, %c0_114] : memref<128x128xbf16, #tpu.memory_space<vmem>>, vector<128x128xbf16>
    %112 = arith.truncf %110 : vector<8x128xf32> to vector<8x128xbf16>
    %cst_115 = arith.constant dense<0.000000e+00> : vector<8x128xf32>
    %113 = tpu.matmul %112, %111, %cst_115 {dimension_numbers = #tpu.dot_dimension_numbers<[1], [0], [0], [1], [0, 0, 1, 1], [], []>} : vector<8x128xbf16>, vector<128x128xbf16>, vector<8x128xf32> -> vector<8x128xf32>
    %c0_116 = arith.constant 0 : index
    %c0_117 = arith.constant 0 : index
    %114 = vector.load %arg17[%c0_116, %c0_117] : memref<1x128xf32, #tpu.memory_space<vmem>>, vector<1x128xf32>
    %115 = vector.broadcast %114 : vector<1x128xf32> to vector<8x128xf32>
    %116 = arith.addf %113, %115 : vector<8x128xf32>
    %cst_118 = arith.constant 0.000000e+00 : f32
    %117 = vector.broadcast %cst_118 : f32 to vector<8x128xf32>
    %118 = arith.cmpf ogt, %116, %117 : vector<8x128xf32>
    %c1_119 = arith.constant 1 : index
    %119 = memref.load %arg0[%c1_119] : memref<3xf32, #tpu.memory_space<smem>>
    %120 = vector.broadcast %119 : f32 to vector<8x128xf32>
    %121 = arith.mulf %116, %120 : vector<8x128xf32>
    %122 = arith.select %118, %116, %121 : vector<8x128xi1>, vector<8x128xf32>
    %c0_120 = arith.constant 0 : index
    %c0_121 = arith.constant 0 : index
    %123 = vector.load %arg18[%c0_120, %c0_121] : memref<128x128xbf16, #tpu.memory_space<vmem>>, vector<128x128xbf16>
    %124 = arith.truncf %122 : vector<8x128xf32> to vector<8x128xbf16>
    %cst_122 = arith.constant dense<0.000000e+00> : vector<8x128xf32>
    %125 = tpu.matmul %124, %123, %cst_122 {dimension_numbers = #tpu.dot_dimension_numbers<[1], [0], [0], [1], [0, 0, 1, 1], [], []>} : vector<8x128xbf16>, vector<128x128xbf16>, vector<8x128xf32> -> vector<8x128xf32>
    %c0_123 = arith.constant 0 : index
    %c0_124 = arith.constant 0 : index
    %126 = vector.load %arg19[%c0_123, %c0_124] : memref<1x128xf32, #tpu.memory_space<vmem>>, vector<1x128xf32>
    %127 = vector.broadcast %126 : vector<1x128xf32> to vector<8x128xf32>
    %128 = arith.addf %125, %127 : vector<8x128xf32>
    %cst_125 = arith.constant 0.000000e+00 : f32
    %129 = vector.broadcast %cst_125 : f32 to vector<8x128xf32>
    %130 = arith.cmpf ogt, %128, %129 : vector<8x128xf32>
    %c2_126 = arith.constant 2 : index
    %131 = memref.load %arg0[%c2_126] : memref<3xf32, #tpu.memory_space<smem>>
    %132 = vector.broadcast %131 : f32 to vector<8x128xf32>
    %133 = arith.mulf %128, %132 : vector<8x128xf32>
    %134 = arith.select %130, %128, %133 : vector<8x128xi1>, vector<8x128xf32>
    %c0_127 = arith.constant 0 : index
    %c0_128 = arith.constant 0 : index
    %135 = vector.load %arg20[%c0_127, %c0_128] : memref<128x128xbf16, #tpu.memory_space<vmem>>, vector<128x128xbf16>
    %136 = arith.truncf %134 : vector<8x128xf32> to vector<8x128xbf16>
    %cst_129 = arith.constant dense<0.000000e+00> : vector<8x128xf32>
    %137 = tpu.matmul %136, %135, %cst_129 {dimension_numbers = #tpu.dot_dimension_numbers<[1], [0], [0], [1], [0, 0, 1, 1], [], []>} : vector<8x128xbf16>, vector<128x128xbf16>, vector<8x128xf32> -> vector<8x128xf32>
    %c0_130 = arith.constant 0 : index
    %c0_131 = arith.constant 0 : index
    %138 = vector.load %arg21[%c0_130, %c0_131] : memref<1x128xf32, #tpu.memory_space<vmem>>, vector<1x128xf32>
    %139 = vector.broadcast %138 : vector<1x128xf32> to vector<8x128xf32>
    %140 = arith.addf %137, %139 : vector<8x128xf32>
    %c0_132 = arith.constant 0 : index
    %c0_133 = arith.constant 0 : index
    %141 = vector.load %arg22[%c0_132, %c0_133] : memref<8x128xf32, #tpu.memory_space<vmem>>, vector<8x128xf32>
    tpu.vector_store %arg22[%c0_132, %c0_133], %140 {strides = array<i32>} : memref<8x128xf32, #tpu.memory_space<vmem>>, vector<8x128xf32>,
    return
  }
}

</mosaic_0001>

<bundles_post_ra>
// kernel: model_forward.1
= control target key start
LH: loop header
LB: loop body
LE: loop exit
PB: predicated region body
PF: predicated region fallthrough
CT: control target
= control target key end

     0   :  { %s4731_s0 = inlined_call_operand.hbm [shape: f32[3], index: 0, kind: input, shape index: {}]   ;;  %s4732_s1 = inlined_call_operand.vmem [shape: s32[256], index: 1, kind: input, shape index: {}]   ;;  %s4733_s2 = inlined_call_operand.vmem [shape: s32[256], index: 2, kind: input, shape index: {}]   ;;  %s4734_s3 = inlined_call_operand.vmem [shape: s32[128], index: 3, kind: input, shape index: {}]   ;;  %s4735_s4 = inlined_call_operand.vmem [shape: f32[128,16], index: 4, kind: input, shape index: {}]   ;;  %s4736_s5 = inlined_call_operand.vmem [shape: f32[256,8], index: 5, kind: input, shape index: {}]   ;;  %s4737_s6 = inlined_call_operand.vmem [shape: f32[16,128], index: 6, kind: input, shape index: {}]   ;;  %s4738_s7 = inlined_call_operand.vmem [shape: f32[1,128], index: 7, kind: input, shape index: {}]   ;;  %s4739_s8 = inlined_call_operand.vmem [shape: f32[8,128], index: 8, kind: input, shape index: {}]   ;;  %s4740_s9 = inlined_call_operand.vmem [shape: f32[1,128], index: 9, kind: input, shape index: {}]   ;;  %s4741_s10 = inlined_call_operand.vmem [shape: bf16[3,128,128], index: 10, kind: input, shape index: {}]   ;;  %s4742_s11 = inlined_call_operand.hbm [shape: f32[3,1,128], index: 11, kind: input, shape index: {}]   ;;  %s4743_s12 = inlined_call_operand.vmem [shape: bf16[3,128,128], index: 12, kind: input, shape index: {}]   ;;  %s4744_s13 = inlined_call_operand.hbm [shape: f32[3,1,128], index: 13, kind: input, shape index: {}]   ;;  %s4745_s14 = inlined_call_operand.hbm [shape: bf16[128,128], index: 14, kind: input, shape index: {}]   ;;  %s4746_s15 = inlined_call_operand.hbm [shape: f32[1,128], index: 15, kind: input, shape index: {}]   ;;  %s4747_s16 = inlined_call_operand.hbm [shape: bf16[128,128], index: 16, kind: input, shape index: {}]   ;;  %s4748_s17 = inlined_call_operand.hbm [shape: f32[1,128], index: 17, kind: input, shape index: {}]   ;;  %s4749_s18 = inlined_call_operand.hbm [shape: bf16[128,128], index: 18, kind: input, shape index: {}]   ;;  %s4750_s19 = inlined_call_operand.hbm [shape: f32[1,128], index: 19, kind: input, shape index: {}]   ;;  %s4751_s20 = inlined_call_operand.hbm [shape: bf16[128,128], index: 20, kind: input, shape index: {}]   ;;  %s4752_s21 = inlined_call_operand.hbm [shape: f32[1,128], index: 21, kind: input, shape index: {}]   ;;  %s4753_s22 = inlined_call_operand.vmem [shape: f32[8,128], index: 22, kind: output, shape index: {}]  }
   0x1   :  { %4757 = sst [smem:[#allocation38_spill]] %s4731_s0 }
   0x2   :  { %4758 = sst [smem:[#allocation39_spill]] %s4732_s1 }
   0x3   :  { %4759 = sst [smem:[#allocation40_spill]] %s4733_s2 }
   0x4   :  { %4760 = sst [smem:[#allocation41_spill]] %s4734_s3 }
   0x5   :  { %4761 = sst [smem:[#allocation42_spill]] %s4735_s4 }
   0x6   :  { %4762 = sst [smem:[#allocation43_spill]] %s4736_s5 }
   0x7   :  { %4763 = sst [smem:[#allocation44_spill]] %s4737_s6 }
   0x8   :  { %27 = vsyncpa [#allocation8], 0 }
   0x9   :  { %28 = vsyncpa [#allocation9], 0 }
   0xa   :  { %29 = vsyncpa [#allocation12], 0 }
   0xb   :  { %30 = vsyncpa [#allocation7], 0 }
   0xc   :  { %31 = vsyncpa [#allocation16], 0 }
   0xd   :  { %32 = vsyncpa [#allocation19], 0 }
   0xe   :  { %33 = vsyncpa [#allocation22], 0 }
   0xf   :  { %34 = vsyncpa [#allocation25], 0  ;;  %s4764_s29 = sld [smem:[#allocation40_spill]] }
  0x15   :  { %s60_s30 = sshll.u32 %s4764_s29, 4  ;;  %s61_s30 = int_to_ptr.vmem [resolvable:$true] %s60_s30 }
  0x16   :  { %35 = vsyncpa [#allocation28], 0  ;;  %s3723_s4 = scalar_lea.vmem %s61_s30, 32  ;;  %p3728_p1 = scmp.lt.s32.totalorder %s61_s30, %s61_s30 }
  0x17   :  { %p3724_p0 = scmp.ne.s32.totalorder %s61_s30, %s3723_s4  ;;  %p3729_p2 = scmp.lt.s32.totalorder %s3723_s4, %s3723_s4 }
  0x19   :  { %p3730_p3 = por %p3729_p2, %p3728_p1 }
  0x1b   :  { %p3731_p4 = pnand %p3730_p3, %p3724_p0 }
  0x1d   :  { %3734 = shalt.err (!%p3731_p4)
}
  0x1e   :  { %s4017_s0 = smov [#allocation11]   ;;  %s4018_s23 = smov [#allocation15]  }
  0x1f   :  { %63 = dma.vmem_to_smem %s61_s30, 32, %s4017_s0, [#allocation12]  }
  0x20   :  { %s107_s1 = sshll.u32 %s4018_s23, 4  ;;  %s4019_s5 = smov [#allocation18]   ;;  %s108_s1 = int_to_ptr.vmem [resolvable:$true] %s107_s1 }
  0x21   :  { %s132_s24 = sshll.u32 %s4019_s5, 4  ;;  %s3743_s6 = scalar_lea.vmem %s108_s1, 48  ;;  %s133_s24 = int_to_ptr.vmem [resolvable:$true] %s132_s24 }
  0x22   :  { %p3744_p5 = scmp.ne.s32.totalorder %s108_s1, %s3743_s6  ;;  %s3747_s25 = scalar_lea.vmem %s108_s1, 64 }
  0x23   :  { %p3748_p6 = scmp.lt.s32.totalorder %s108_s1, %s108_s1  ;;  %p3749_p7 = scmp.lt.s32.totalorder %s3747_s25, %s3743_s6 }
  0x25   :  { %p3750_p8 = por %p3749_p7, %p3748_p6 }
  0x27   :  { %p3751_p9 = pnand %p3750_p8, %p3744_p5 }
  0x29   :  { %3754 = shalt.err (!%p3751_p9)
}
  0x2a   :  { %s4020_s26 = smov 16   ;;  %s4021_s2 = smov 1  }
  0x2b   :  { %113 = dma.hbm_to_vmem [thread:$0]  %s4744_s13, 48, %s108_s1, [#allocation16], %s4020_s26, %s4020_s26, %s4021_s2  }
  0x2c   :  { %s3763_s28 = scalar_lea.vmem %s133_s24, 16  ;;  %s3767_s29 = scalar_lea.vmem %s133_s24, 32 }
  0x2d   :  { %p3764_p10 = scmp.ne.s32.totalorder %s133_s24, %s3763_s28  ;;  %p3768_p11 = scmp.lt.s32.totalorder %s133_s24, %s133_s24 }
  0x2e   :  { %p3769_p12 = scmp.lt.s32.totalorder %s3767_s29, %s3763_s28 }
  0x30   :  { %p3770_p13 = por %p3769_p12, %p3768_p11 }
  0x32   :  { %p3771_p0 = pnand %p3770_p13, %p3764_p10 }
  0x34   :  { %3774 = shalt.err (!%p3771_p0)
}
  0x35   :  { %135 = dma.hbm_to_vmem [thread:$0]  %s4746_s15, 16, %s133_s24, [#allocation19]  }
  0x36   :  { %s4022_s0 = smov [#allocation21]   ;;  %s4023_s5 = smov [#allocation24]  }
  0x37   :  { %s154_s23 = sshll.u32 %s4022_s0, 4  ;;  %s176_s6 = sshll.u32 %s4023_s5, 4  ;;  %s155_s23 = int_to_ptr.vmem [resolvable:$true] %s154_s23  ;;  %s177_s6 = int_to_ptr.vmem [resolvable:$true] %s176_s6 }
  0x38   :  { %s3783_s25 = scalar_lea.vmem %s155_s23, 16  ;;  %s3787_s13 = scalar_lea.vmem %s155_s23, 32 }
  0x39   :  { %p3784_p1 = scmp.ne.s32.totalorder %s155_s23, %s3783_s25  ;;  %p3788_p2 = scmp.lt.s32.totalorder %s155_s23, %s155_s23 }
  0x3a   :  { %p3789_p3 = scmp.lt.s32.totalorder %s3787_s13, %s3783_s25 }
  0x3c   :  { %p3790_p4 = por %p3789_p3, %p3788_p2 }
  0x3e   :  { %p3791_p5 = pnand %p3790_p4, %p3784_p1 }
  0x40   :  { %3794 = shalt.err (!%p3791_p5)
}
  0x41   :  { %157 = dma.hbm_to_vmem [thread:$0]  %s4748_s17, 16, %s155_s23, [#allocation22]  }
  0x42   :  { %s3803_s3 = scalar_lea.vmem %s177_s6, 16  ;;  %s3807_s15 = scalar_lea.vmem %s177_s6, 32 }
  0x43   :  { %p3804_p6 = scmp.ne.s32.totalorder %s177_s6, %s3803_s3  ;;  %p3808_p7 = scmp.lt.s32.totalorder %s177_s6, %s177_s6 }
  0x44   :  { %p3809_p8 = scmp.lt.s32.totalorder %s3807_s15, %s3803_s3 }
  0x46   :  { %p3810_p9 = por %p3809_p8, %p3808_p7 }
  0x48   :  { %p3811_p10 = pnand %p3810_p9, %p3804_p6 }
  0x4a   :  { %3814 = shalt.err (!%p3811_p10)
}
  0x4b   :  { %179 = dma.hbm_to_vmem [thread:$0]  %s4750_s19, 16, %s177_s6, [#allocation25]  }
  0x4c   :  { %s4024_s29 = smov [#allocation6]   ;;  %s4765_s0 = sld [smem:[#allocation38_spill]] }
  0x4d   :  { %s4766_s23 = sld [smem:[#allocation39_spill]] }
  0x4e   :  { %s4767_s27 = sld [smem:[#allocation41_spill]] }
  0x52   :  { %43 = dma.hbm_to_smem %s4765_s0, 16, %s4024_s29, [#allocation8]  }
  0x53   :  { %s50_s25 = sshll.u32 %s4766_s23, 4  ;;  %s51_s25 = int_to_ptr.vmem [resolvable:$true] %s50_s25 }
  0x54   :  { %s70_s3 = sshll.u32 %s4767_s27, 4  ;;  %s3823_s15 = scalar_lea.vmem %s51_s25, 32  ;;  %s71_s3 = int_to_ptr.vmem [resolvable:$true] %s70_s3 }
  0x55   :  { %p3824_p11 = scmp.ne.s32.totalorder %s51_s25, %s3823_s15  ;;  %p3828_p12 = scmp.lt.s32.totalorder %s51_s25, %s51_s25 }
  0x56   :  { %p3829_p13 = scmp.lt.s32.totalorder %s3823_s15, %s3823_s15 }
  0x58   :  { %p3830_p0 = por %p3829_p13, %p3828_p12 }
  0x5a   :  { %p3831_p1 = pnand %p3830_p0, %p3824_p11 }
  0x5c   :  { %3834 = shalt.err (!%p3831_p1)
}
  0x5d   :  { %s4025_s19 = smov [#allocation10]   ;;  %s3835_s6 = scalar_lea.vmem %s71_s3, 16 }
  0x5e   :  { %53 = dma.vmem_to_smem %s51_s25, 32, %s4025_s19, [#allocation9]  }
  0x5f   :  { %p3836_p2 = scmp.ne.s32.totalorder %s71_s3, %s3835_s6  ;;  %p3840_p3 = scmp.lt.s32.totalorder %s71_s3, %s71_s3 }
  0x60   :  { %p3841_p4 = scmp.lt.s32.totalorder %s3835_s6, %s3835_s6 }
  0x62   :  { %p3842_p5 = por %p3841_p4, %p3840_p3 }
  0x64   :  { %p3843_p6 = pnand %p3842_p5, %p3836_p2 }
  0x66   :  { %3846 = shalt.err (!%p3843_p6)
}
  0x67   :  { %s4026_s24 = smov [#allocation13]   ;;  %s4027_s28 = smov [#allocation14]  }
  0x68   :  { %73 = dma.vmem_to_smem %s71_s3, 16, %s4026_s24, [#allocation12]  }
  0x69   :  { %s93_s29 = sshll.u32 %s4027_s28, 4  ;;  %s4028_s30 = smov [#allocation17]   ;;  %s94_s29 = int_to_ptr.vmem [resolvable:$true] %s93_s29 }
  0x6a   :  { %s119_s4 = sshll.u32 %s4028_s30, 4  ;;  %s3855_s0 = scalar_lea.vmem %s94_s29, 48  ;;  %s120_s4 = int_to_ptr.vmem [resolvable:$true] %s119_s4 }
  0x6b   :  { %p3856_p7 = scmp.ne.s32.totalorder %s94_s29, %s3855_s0  ;;  %s3859_s5 = scalar_lea.vmem %s94_s29, 64 }
  0x6c   :  { %p3860_p8 = scmp.lt.s32.totalorder %s94_s29, %s94_s29  ;;  %p3861_p9 = scmp.lt.s32.totalorder %s3859_s5, %s3855_s0 }
  0x6e   :  { %p3862_p10 = por %p3861_p9, %p3860_p8 }
  0x70   :  { %p3863_p11 = pnand %p3862_p10, %p3856_p7 }
  0x72   :  { %3866 = shalt.err (!%p3863_p11)
}
  0x73   :  { %99 = dma.hbm_to_vmem [thread:$0]  %s4742_s11, 48, %s94_s29, [#allocation7], %s4020_s26, %s4020_s26, %s4021_s2  }
  0x74   :  { %s3875_s25 = scalar_lea.vmem %s120_s4, 1024  ;;  %p3880_p13 = scmp.lt.s32.totalorder %s120_s4, %s120_s4 }
  0x75   :  { %p3876_p12 = scmp.ne.s32.totalorder %s120_s4, %s3875_s25  ;;  %p3881_p0 = scmp.lt.s32.totalorder %s3875_s25, %s3875_s25 }
  0x77   :  { %p3882_p1 = por %p3881_p0, %p3880_p13 }
  0x79   :  { %p3883_p2 = pnand %p3882_p1, %p3876_p12 }
  0x7b   :  { %3886 = shalt.err (!%p3883_p2)
}
  0x7c   :  { %s4029_s13 = smov 64   ;;  %s4030_s1 = smov 4  }
  0x7d   :  { %125 = dma.hbm_to_vmem [thread:$0]  %s4745_s14, 1024, %s120_s4, [#allocation16], %s4029_s13, %s4029_s13, %s4030_s1  }
  0x7e   :  { %s4031_s15 = smov [#allocation20]   ;;  %s4032_s6 = smov [#allocation23]  }
  0x7f   :  { %s141_s19 = sshll.u32 %s4031_s15, 4  ;;  %s163_s11 = sshll.u32 %s4032_s6, 4  ;;  %s142_s19 = int_to_ptr.vmem [resolvable:$true] %s141_s19  ;;  %s164_s11 = int_to_ptr.vmem [resolvable:$true] %s163_s11 }
  0x80   :  { %s3895_s26 = scalar_lea.vmem %s142_s19, 1024  ;;  %p3900_p4 = scmp.lt.s32.totalorder %s142_s19, %s142_s19 }
  0x81   :  { %p3896_p3 = scmp.ne.s32.totalorder %s142_s19, %s3895_s26  ;;  %p3901_p5 = scmp.lt.s32.totalorder %s3895_s26, %s3895_s26 }
  0x83   :  { %p3902_p6 = por %p3901_p5, %p3900_p4 }
  0x85   :  { %p3903_p7 = pnand %p3902_p6, %p3896_p3 }
  0x87   :  { %3906 = shalt.err (!%p3903_p7)
}
  0x88   :  { %147 = dma.hbm_to_vmem [thread:$0]  %s4747_s16, 1024, %s142_s19, [#allocation19], %s4029_s13, %s4029_s13, %s4030_s1  }
  0x89   :  { %s3915_s14 = scalar_lea.vmem %s164_s11, 1024  ;;  %p3920_p9 = scmp.lt.s32.totalorder %s164_s11, %s164_s11 }
  0x8a   :  { %p3916_p8 = scmp.ne.s32.totalorder %s164_s11, %s3915_s14  ;;  %p3921_p10 = scmp.lt.s32.totalorder %s3915_s14, %s3915_s14 }
  0x8c   :  { %p3922_p11 = por %p3921_p10, %p3920_p9 }
  0x8e   :  { %p3923_p12 = pnand %p3922_p11, %p3916_p8 }
  0x90   :  { %3926 = shalt.err (!%p3923_p12)
}
  0x91   :  { %169 = dma.hbm_to_vmem [thread:$0]  %s4749_s18, 1024, %s164_s11, [#allocation22], %s4029_s13, %s4029_s13, %s4030_s1  }
  0x92   :  { %s4033_s30 = smov [#allocation26]   ;;  %s4034_s0 = smov [#allocation27]  }
  0x93   :  { %s185_s4 = sshll.u32 %s4033_s30, 4  ;;  %s198_s5 = sshll.u32 %s4034_s0, 4  ;;  %s186_s4 = int_to_ptr.vmem [resolvable:$true] %s185_s4  ;;  %s199_s5 = int_to_ptr.vmem [resolvable:$true] %s198_s5 }
  0x94   :  { %s3935_s16 = scalar_lea.vmem %s186_s4, 1024  ;;  %p3940_p0 = scmp.lt.s32.totalorder %s186_s4, %s186_s4 }
  0x95   :  { %p3936_p13 = scmp.ne.s32.totalorder %s186_s4, %s3935_s16  ;;  %p3941_p1 = scmp.lt.s32.totalorder %s3935_s16, %s3935_s16 }
  0x97   :  { %p3942_p2 = por %p3941_p1, %p3940_p0 }
  0x99   :  { %p3943_p3 = pnand %p3942_p2, %p3936_p13 }
  0x9b   :  { %3946 = shalt.err (!%p3943_p3)
}
  0x9c   :  { %191 = dma.hbm_to_vmem [thread:$0]  %s4751_s20, 1024, %s186_s4, [#allocation25], %s4029_s13, %s4029_s13, %s4030_s1  }
  0x9d   :  { %s3955_s18 = scalar_lea.vmem %s199_s5, 16  ;;  %s3959_s25 = scalar_lea.vmem %s199_s5, 32 }
  0x9e   :  { %p3956_p4 = scmp.ne.s32.totalorder %s199_s5, %s3955_s18  ;;  %p3960_p5 = scmp.lt.s32.totalorder %s199_s5, %s199_s5 }
  0x9f   :  { %p3961_p6 = scmp.lt.s32.totalorder %s3959_s25, %s3955_s18 }
  0xa1   :  { %p3962_p7 = por %p3961_p6, %p3960_p5 }
  0xa3   :  { %p3963_p8 = pnand %p3962_p7, %p3956_p4 }
  0xa5   :  { %3966 = shalt.err (!%p3963_p8)
}
  0xa6   :  { %201 = dma.hbm_to_vmem [thread:$0]  %s4752_s21, 16, %s199_s5, [#allocation28]  }
  0xa7   :  { %3983 = dma.done.wait [#allocation8], 16  }
  0xa8   :  { %3984 = vsyncadd [#allocation8], 4294967280 }
  0xa9   :  { %3985 = dma.done.wait [#allocation9], 32  }
  0xaa   :  { %3986 = vsyncadd [#allocation9], 4294967264 }
  0xab   :  { %3987 = dma.done.wait [#allocation12], 48  }
  0xac   :  { %3988 = vsyncadd [#allocation12], 4294967248 }
  0xad   :  { %3989 = dma.done.wait [#allocation7], 48  }
  0xae   :  { %3990 = vsyncadd [#allocation7], 4294967248 }
  0xaf   :  { %3991 = dma.done.wait [#allocation16], 1072  }
  0xb0   :  { %3992 = vsyncadd [#allocation16], 4294966224 }
  0xb1   :  { %3993 = dma.done.wait [#allocation19], 1040  }
  0xb2   :  { %3994 = vsyncadd [#allocation19], 4294966256 }
  0xb3   :  { %3995 = dma.done.wait [#allocation22], 1040  }
  0xb4   :  { %3996 = vsyncadd [#allocation22], 4294966256 }
  0xb5   :  { %3997 = dma.done.wait [#allocation25], 1040  }
  0xb6   :  { %3998 = vsyncadd [#allocation25], 4294966256 }
  0xb7   :  { %3999 = dma.done.wait [#allocation28], 16  }
  0xb8   :  { %4000 = vsyncadd [#allocation28], 4294967280 }
  0xb9   :  { %244 = sfence }
  0xba   :  { %v529_v0 = vld [vmem:[%s4739_s8] sm:$0xff]  ;;  %s4768_s15 = sld [smem:[#allocation43_spill]]  ;;  %vm537_vm0 = vcmask 64512   ;;  %vm271_vm1 = vcmask 130048   ;;  %v4035_v51 = vmov 0.0  }
  0xbb   :  { %3269 = vmatprep.subr.mxu1 %v529_v0  ;;  %s4769_s28 = sld [smem:[#allocation44_spill]]  ;;  %891 = vst [vmem:[#allocation4] sm:$0xff] %v4035_v51  ;;  %892 = vst [vmem:[#allocation4 + $0x8] sm:$0xff] %v4035_v51  ;;  %v4432_v52 = vld [vmem:[%s4740_s9] ss:$0 sm:$0xff] }
  0xbc   :  { %3270 = vmatpush3.msra.mxu1 %v529_v0  ;;  %s4770_s17 = sld [smem:[#allocation42_spill]]  ;;  %893 = vst [vmem:[#allocation4 + $0x10] sm:$0xff] %v4035_v51  ;;  %894 = vst [vmem:[#allocation4 + $0x18] sm:$0xff] %v4035_v51  ;;  %v4439_v58 = vld [vmem:[%s4738_s7] ss:$0 sm:$0xff]  ;;  %s4001_s7 = smov 0  }
  0xbd   :  { %895 = vst [vmem:[#allocation4 + $0x20] sm:$0xff] %v4035_v51  ;;  %896 = vst [vmem:[#allocation4 + $0x28] sm:$0xff] %v4035_v51 }
  0xbe   :  { %897 = vst [vmem:[#allocation4 + $0x30] sm:$0xff] %v4035_v51  ;;  %898 = vst [vmem:[#allocation4 + $0x38] sm:$0xff] %v4035_v51 }
  0xbf   :  { %899 = vst [vmem:[#allocation4 + $0x40] sm:$0xff] %v4035_v51  ;;  %900 = vst [vmem:[#allocation4 + $0x48] sm:$0xff] %v4035_v51 }
  0xc0   :  { %v497_v1 = vld [vmem:[%s4768_s15] sm:$0xff]  ;;  %v498_v2 = vld [vmem:[%s4768_s15 + $0x8] sm:$0xff]  ;;  %v499_v3 = vld [vmem:[%s4768_s15 + $0x10] sm:$0xff]  ;;  %901 = vst [vmem:[#allocation4 + $0x50] sm:$0xff] %v4035_v51 }
  0xc1   :  { %3271 = vmatprep.mubr.msk.f32.mxu1 %vm537_vm0, %v497_v1  ;;  %v500_v4 = vld [vmem:[%s4768_s15 + $0x18] sm:$0xff]  ;;  %v263_v5 = vld [vmem:[%s4769_s28 + $0x8] sm:$0xff]  ;;  %v501_v6 = vld [vmem:[%s4768_s15 + $0x20] sm:$0xff]  ;;  %902 = vst [vmem:[#allocation4 + $0x58] sm:$0xff] %v4035_v51 }
  0xc2   :  { %3272 = vmatmul.mubr.msk.f32.vlgmr.msra.gmra.mxu1 %vm537_vm0, %v498_v2  ;;  %3241 = vmatprep.subr.mxu0 %v263_v5  ;;  %v262_v7 = vld [vmem:[%s4769_s28] sm:$0xff]  ;;  %v247_v9 = vld [vmem:[%s4770_s17 + $0x8] sm:$0xff]  ;;  %v248_v10 = vld [vmem:[%s4770_s17 + $0x10] sm:$0xff]  ;;  %903 = vst [vmem:[#allocation4 + $0x60] sm:$0xff] %v4035_v51 }
  0xc3   :  { %3274 = vmatprep.mubr.msk.f32.mxu1 %vm537_vm0, %v499_v3  ;;  %v246_v8 = vld [vmem:[%s4770_s17] sm:$0xff]  ;;  %3242 = vmatpush3.msra.mxu0 %v263_v5  ;;  %v502_v11 = vld [vmem:[%s4768_s15 + $0x28] sm:$0xff]  ;;  %v503_v12 = vld [vmem:[%s4768_s15 + $0x30] sm:$0xff]  ;;  %904 = vst [vmem:[#allocation4 + $0x68] sm:$0xff] %v4035_v51 }
  0xc4   :  { %3245 = vmatprep.mubr.msk.f32.mxu0 %vm271_vm1, %v246_v8  ;;  %3243 = vmatprep.subr.mxu0 %v262_v7  ;;  %v249_v13 = vld [vmem:[%s4770_s17 + $0x18] sm:$0xff]  ;;  %v250_v14 = vld [vmem:[%s4770_s17 + $0x20] sm:$0xff]  ;;  %v251_v17 = vld [vmem:[%s4770_s17 + $0x28] sm:$0xff]  ;;  %905 = vst [vmem:[#allocation4 + $0x70] sm:$0xff] %v4035_v51 }
  0xc5   :  { %3244 = vmatpush3.msra.mxu0 %v262_v7  ;;  %v504_v15 = vld [vmem:[%s4768_s15 + $0x38] sm:$0xff]  ;;  %v505_v16 = vld [vmem:[%s4768_s15 + $0x40] sm:$0xff]  ;;  %v252_v18 = vld [vmem:[%s4770_s17 + $0x30] sm:$0xff]  ;;  %906 = vst [vmem:[#allocation4 + $0x78] sm:$0xff] %v4035_v51 }
  0xc6   :  { %3275 = vmatmul.mubr.msk.f32.gmra.mxu1 %vm537_vm0, %v500_v4  ;;  %3246 = vmatmul.mubr.msk.f32.vlgmr.msra.gmra.mxu0 %vm271_vm1, %v247_v9  ;;  %v506_v19 = vld [vmem:[%s4768_s15 + $0x48] sm:$0xff]  ;;  %v507_v20 = vld [vmem:[%s4768_s15 + $0x50] sm:$0xff]  ;;  %v253_v21 = vld [vmem:[%s4770_s17 + $0x38] sm:$0xff] }
  0xc7   :  { %3277 = vmatprep.mubr.msk.f32.mxu1 %vm537_vm0, %v501_v6  ;;  %3248 = vmatprep.mubr.msk.f32.mxu0 %vm271_vm1, %v248_v10  ;;  %v254_v22 = vld [vmem:[%s4770_s17 + $0x40] sm:$0xff]  ;;  %v508_v23 = vld [vmem:[%s4768_s15 + $0x58] sm:$0xff]  ;;  %v255_v25 = vld [vmem:[%s4770_s17 + $0x48] sm:$0xff] }
  0xc8   :  { %v509_v24 = vld [vmem:[%s4768_s15 + $0x60] sm:$0xff]  ;;  %v256_v26 = vld [vmem:[%s4770_s17 + $0x50] sm:$0xff]  ;;  %v510_v27 = vld [vmem:[%s4768_s15 + $0x68] sm:$0xff] }
  0xc9   :  { %v511_v28 = vld [vmem:[%s4768_s15 + $0x70] sm:$0xff]  ;;  %v257_v29 = vld [vmem:[%s4770_s17 + $0x58] sm:$0xff]  ;;  %v258_v30 = vld [vmem:[%s4770_s17 + $0x60] sm:$0xff] }
  0xca   :  { %3278 = vmatmul.mubr.msk.f32.gmra.mxu1 %vm537_vm0, %v502_v11  ;;  %3249 = vmatmul.mubr.msk.f32.gmra.mxu0 %vm271_vm1, %v249_v13  ;;  %v512_v31 = vld [vmem:[%s4768_s15 + $0x78] sm:$0xff]  ;;  %v513_v32 = vld [vmem:[%s4768_s15 + $0x80] sm:$0xff]  ;;  %v259_v33 = vld [vmem:[%s4770_s17 + $0x68] sm:$0xff] }
  0xcb   :  { %3280 = vmatprep.mubr.msk.f32.mxu1 %vm537_vm0, %v503_v12  ;;  %3251 = vmatprep.mubr.msk.f32.mxu0 %vm271_vm1, %v250_v14  ;;  %v260_v34 = vld [vmem:[%s4770_s17 + $0x70] sm:$0xff]  ;;  %v514_v35 = vld [vmem:[%s4768_s15 + $0x88] sm:$0xff]  ;;  %v261_v37 = vld [vmem:[%s4770_s17 + $0x78] sm:$0xff] }
  0xcc   :  { %v515_v36 = vld [vmem:[%s4768_s15 + $0x90] sm:$0xff]  ;;  %v516_v38 = vld [vmem:[%s4768_s15 + $0x98] sm:$0xff]  ;;  %v517_v39 = vld [vmem:[%s4768_s15 + $0xa0] sm:$0xff] }
  0xcd   :  { %v518_v40 = vld [vmem:[%s4768_s15 + $0xa8] sm:$0xff]  ;;  %v519_v41 = vld [vmem:[%s4768_s15 + $0xb0] sm:$0xff]  ;;  %v520_v42 = vld [vmem:[%s4768_s15 + $0xb8] sm:$0xff] }
  0xce   :  { %3281 = vmatmul.mubr.msk.f32.gmra.mxu1 %vm537_vm0, %v504_v15  ;;  %3252 = vmatmul.mubr.msk.f32.gmra.mxu0 %vm271_vm1, %v251_v17  ;;  %v521_v43 = vld [vmem:[%s4768_s15 + $0xc0] sm:$0xff]  ;;  %v522_v44 = vld [vmem:[%s4768_s15 + $0xc8] sm:$0xff]  ;;  %v523_v45 = vld [vmem:[%s4768_s15 + $0xd0] sm:$0xff] }
  0xcf   :  { %3283 = vmatprep.mubr.msk.f32.mxu1 %vm537_vm0, %v505_v16  ;;  %3254 = vmatprep.mubr.msk.f32.mxu0 %vm271_vm1, %v252_v18  ;;  %v524_v46 = vld [vmem:[%s4768_s15 + $0xd8] sm:$0xff]  ;;  %v525_v47 = vld [vmem:[%s4768_s15 + $0xe0] sm:$0xff]  ;;  %v526_v48 = vld [vmem:[%s4768_s15 + $0xe8] sm:$0xff] }
  0xd0   :  { %v527_v49 = vld [vmem:[%s4768_s15 + $0xf0] sm:$0xff]  ;;  %v528_v50 = vld [vmem:[%s4768_s15 + $0xf8] sm:$0xff] }
  0xd2   :  { %3284 = vmatmul.mubr.msk.f32.gmra.mxu1 %vm537_vm0, %v506_v19  ;;  %3255 = vmatmul.mubr.msk.f32.gmra.mxu0 %vm271_vm1, %v253_v21 }
  0xd3   :  { %3286 = vmatprep.mubr.msk.f32.mxu1 %vm537_vm0, %v507_v20  ;;  %3257 = vmatprep.mubr.msk.f32.mxu0 %vm271_vm1, %v254_v22 }
  0xd6   :  { %3287 = vmatmul.mubr.msk.f32.gmra.mxu1 %vm537_vm0, %v508_v23  ;;  %3258 = vmatmul.mubr.msk.f32.gmra.mxu0 %vm271_vm1, %v255_v25 }
  0xd7   :  { %3289 = vmatprep.mubr.msk.f32.mxu1 %vm537_vm0, %v509_v24  ;;  %3260 = vmatprep.mubr.msk.f32.mxu0 %vm271_vm1, %v256_v26 }
  0xda   :  { %3290 = vmatmul.mubr.msk.f32.gmra.mxu1 %vm537_vm0, %v510_v27  ;;  %3261 = vmatmul.mubr.msk.f32.gmra.mxu0 %vm271_vm1, %v257_v29 }
  0xdb   :  { %3292 = vmatprep.mubr.msk.f32.mxu1 %vm537_vm0, %v511_v28  ;;  %3263 = vmatprep.mubr.msk.f32.mxu0 %vm271_vm1, %v258_v30 }
  0xde   :  { %3293 = vmatmul.mubr.msk.f32.gmra.mxu1 %vm537_vm0, %v512_v31  ;;  %3264 = vmatmul.mubr.msk.f32.gmra.mxu0 %vm271_vm1, %v259_v33 }
  0xdf   :  { %3295 = vmatprep.mubr.msk.f32.mxu1 %vm537_vm0, %v513_v32  ;;  %3266 = vmatprep.mubr.msk.f32.mxu0 %vm271_vm1, %v260_v34 }
  0xe2   :  { %3296 = vmatmul.mubr.msk.f32.gmra.mxu1 %vm537_vm0, %v514_v35  ;;  %3267 = vmatmul.mubr.msk.f32.gmra.mxu0 %vm271_vm1, %v261_v37 }
  0xe3   :  { %3298 = vmatprep.mubr.msk.f32.mxu1 %vm537_vm0, %v515_v36 }
  0xe6   :  { %3299 = vmatmul.mubr.msk.f32.gmra.mxu1 %vm537_vm0, %v516_v38 }
  0xe7   :  { %3301 = vmatprep.mubr.msk.f32.mxu1 %vm537_vm0, %v517_v39 }
  0xea   :  { %3302 = vmatmul.mubr.msk.f32.gmra.mxu1 %vm537_vm0, %v518_v40 }
  0xeb   :  { %3304 = vmatprep.mubr.msk.f32.mxu1 %vm537_vm0, %v519_v41 }
  0xee   :  { %3305 = vmatmul.mubr.msk.f32.gmra.mxu1 %vm537_vm0, %v520_v42 }
  0xef   :  { %3307 = vmatprep.mubr.msk.f32.mxu1 %vm537_vm0, %v521_v43 }
  0xf2   :  { %3308 = vmatmul.mubr.msk.f32.gmra.mxu1 %vm537_vm0, %v522_v44 }
  0xf3   :  { %3310 = vmatprep.mubr.msk.f32.mxu1 %vm537_vm0, %v523_v45 }
  0xf6   :  { %3311 = vmatmul.mubr.msk.f32.gmra.mxu1 %vm537_vm0, %v524_v46 }
  0xf7   :  { %3313 = vmatprep.mubr.msk.f32.mxu1 %vm537_vm0, %v525_v47 }
  0xfa   :  { %3314 = vmatmul.mubr.msk.f32.gmra.mxu1 %vm537_vm0, %v526_v48 }
  0xfb   :  { %3316 = vmatprep.mubr.msk.f32.mxu1 %vm537_vm0, %v527_v49 }
  0xfe   :  { %3317 = vmatmul.mubr.msk.f32.gmra.mxu1 %vm537_vm0, %v528_v50 }
 0x182   :  { %v3273_v53 = vpop.f32.mrf.mxu1 }
 0x183   :  { %v706_v54 = vadd.f32 %v3273_v53, %v4432_v52 }
 0x184   :  { %v700_v55 = vpop.f32.mrf.mxu1 }
 0x185   :  { %860 = vst [vmem:[#allocation3 + $0x8] sm:$0xff] %v706_v54  ;;  %v701_v56 = vadd.f32 %v4432_v52, %v700_v55 }
 0x186   :  { %v3276_v57 = vpop.f32.mrf.mxu1  ;;  %v3247_v61 = vpop.f32.mrf.mxu0 }
 0x187   :  { %859 = vst [vmem:[#allocation3] sm:$0xff] %v701_v56  ;;  %v716_v59 = vadd.f32 %v3276_v57, %v4432_v52  ;;  %v392_v63 = vadd.f32 %v3247_v61, %v4439_v58 }
 0x188   :  { %v710_v60 = vpop.f32.mrf.mxu1  ;;  %v386_v1 = vpop.f32.mrf.mxu0 }
 0x189   :  { %862 = vst [vmem:[#allocation3 + $0x18] sm:$0xff] %v716_v59  ;;  %v711_v62 = vadd.f32 %v4432_v52, %v710_v60  ;;  %v466_v3 = vmax.f32 %v392_v63, 0.0  ;;  %v387_v4 = vadd.f32 %v4439_v58, %v386_v1 }
 0x18a   :  { %v3279_v0 = vpop.f32.mrf.mxu1  ;;  %v3250_v6 = vpop.f32.mrf.mxu0 }
 0x18b   :  { %861 = vst [vmem:[#allocation3 + $0x10] sm:$0xff] %v711_v62  ;;  %v726_v2 = vadd.f32 %v3279_v0, %v4432_v52  ;;  %482 = vst [vmem:[#allocation2 + $0x8] sm:$0xff] %v466_v3  ;;  %v465_v8 = vmax.f32 %v387_v4, 0.0  ;;  %v402_v9 = vadd.f32 %v3250_v6, %v4439_v58 }
 0x18c   :  { %v720_v5 = vpop.f32.mrf.mxu1  ;;  %v396_v11 = vpop.f32.mrf.mxu0 }
 0x18d   :  { %864 = vst [vmem:[#allocation3 + $0x28] sm:$0xff] %v726_v2  ;;  %v721_v7 = vadd.f32 %v4432_v52, %v720_v5  ;;  %481 = vst [vmem:[#allocation2] sm:$0xff] %v465_v8  ;;  %v468_v13 = vmax.f32 %v402_v9, 0.0  ;;  %v397_v14 = vadd.f32 %v4439_v58, %v396_v11 }
 0x18e   :  { %v3282_v10 = vpop.f32.mrf.mxu1  ;;  %v3253_v16 = vpop.f32.mrf.mxu0 }
 0x18f   :  { %863 = vst [vmem:[#allocation3 + $0x20] sm:$0xff] %v721_v7  ;;  %v736_v12 = vadd.f32 %v3282_v10, %v4432_v52  ;;  %484 = vst [vmem:[#allocation2 + $0x18] sm:$0xff] %v468_v13  ;;  %v467_v18 = vmax.f32 %v397_v14, 0.0  ;;  %v412_v19 = vadd.f32 %v3253_v16, %v4439_v58 }
 0x190   :  { %v730_v15 = vpop.f32.mrf.mxu1  ;;  %v406_v21 = vpop.f32.mrf.mxu0 }
 0x191   :  { %866 = vst [vmem:[#allocation3 + $0x38] sm:$0xff] %v736_v12  ;;  %v731_v17 = vadd.f32 %v4432_v52, %v730_v15  ;;  %483 = vst [vmem:[#allocation2 + $0x10] sm:$0xff] %v467_v18  ;;  %v470_v23 = vmax.f32 %v412_v19, 0.0  ;;  %v407_v24 = vadd.f32 %v4439_v58, %v406_v21 }
 0x192   :  { %v3285_v20 = vpop.f32.mrf.mxu1  ;;  %v3256_v26 = vpop.f32.mrf.mxu0 }
 0x193   :  { %865 = vst [vmem:[#allocation3 + $0x30] sm:$0xff] %v731_v17  ;;  %v746_v22 = vadd.f32 %v3285_v20, %v4432_v52  ;;  %486 = vst [vmem:[#allocation2 + $0x28] sm:$0xff] %v470_v23  ;;  %v469_v28 = vmax.f32 %v407_v24, 0.0  ;;  %v422_v29 = vadd.f32 %v3256_v26, %v4439_v58 }
 0x194   :  { %v740_v25 = vpop.f32.mrf.mxu1  ;;  %v416_v31 = vpop.f32.mrf.mxu0 }
 0x195   :  { %868 = vst [vmem:[#allocation3 + $0x48] sm:$0xff] %v746_v22  ;;  %v741_v27 = vadd.f32 %v4432_v52, %v740_v25  ;;  %485 = vst [vmem:[#allocation2 + $0x20] sm:$0xff] %v469_v28  ;;  %v472_v33 = vmax.f32 %v422_v29, 0.0  ;;  %v417_v34 = vadd.f32 %v4439_v58, %v416_v31 }
 0x196   :  { %v3288_v30 = vpop.f32.mrf.mxu1  ;;  %v3259_v36 = vpop.f32.mrf.mxu0 }
 0x197   :  { %867 = vst [vmem:[#allocation3 + $0x40] sm:$0xff] %v741_v27  ;;  %v756_v32 = vadd.f32 %v3288_v30, %v4432_v52  ;;  %488 = vst [vmem:[#allocation2 + $0x38] sm:$0xff] %v472_v33  ;;  %v471_v38 = vmax.f32 %v417_v34, 0.0  ;;  %v432_v39 = vadd.f32 %v3259_v36, %v4439_v58 }
 0x198   :  { %v750_v35 = vpop.f32.mrf.mxu1  ;;  %v426_v41 = vpop.f32.mrf.mxu0 }
 0x199   :  { %870 = vst [vmem:[#allocation3 + $0x58] sm:$0xff] %v756_v32  ;;  %v751_v37 = vadd.f32 %v4432_v52, %v750_v35  ;;  %487 = vst [vmem:[#allocation2 + $0x30] sm:$0xff] %v471_v38  ;;  %v474_v43 = vmax.f32 %v432_v39, 0.0  ;;  %v427_v44 = vadd.f32 %v4439_v58, %v426_v41 }
 0x19a   :  { %v3291_v40 = vpop.f32.mrf.mxu1  ;;  %v3262_v46 = vpop.f32.mrf.mxu0 }
 0x19b   :  { %869 = vst [vmem:[#allocation3 + $0x50] sm:$0xff] %v751_v37  ;;  %v766_v42 = vadd.f32 %v3291_v40, %v4432_v52  ;;  %490 = vst [vmem:[#allocation2 + $0x48] sm:$0xff] %v474_v43  ;;  %v473_v48 = vmax.f32 %v427_v44, 0.0  ;;  %v442_v49 = vadd.f32 %v3262_v46, %v4439_v58 }
 0x19c   :  { %v760_v45 = vpop.f32.mrf.mxu1  ;;  %v436_v53 = vpop.f32.mrf.mxu0 }
 0x19d   :  { %872 = vst [vmem:[#allocation3 + $0x68] sm:$0xff] %v766_v42  ;;  %v761_v47 = vadd.f32 %v4432_v52, %v760_v45  ;;  %489 = vst [vmem:[#allocation2 + $0x40] sm:$0xff] %v473_v48  ;;  %v476_v55 = vmax.f32 %v442_v49, 0.0  ;;  %v437_v56 = vadd.f32 %v4439_v58, %v436_v53 }
 0x19e   :  { %v3294_v50 = vpop.f32.mrf.mxu1  ;;  %v3265_v59 = vpop.f32.mrf.mxu0 }
 0x19f   :  { %871 = vst [vmem:[#allocation3 + $0x60] sm:$0xff] %v761_v47  ;;  %v776_v54 = vadd.f32 %v3294_v50, %v4432_v52  ;;  %492 = vst [vmem:[#allocation2 + $0x58] sm:$0xff] %v476_v55  ;;  %v475_v61 = vmax.f32 %v437_v56, 0.0  ;;  %v452_v62 = vadd.f32 %v3265_v59, %v4439_v58 }
 0x1a0   :  { %v770_v57 = vpop.f32.mrf.mxu1  ;;  %v446_v0 = vpop.f32.mrf.mxu0 }
 0x1a1   :  { %874 = vst [vmem:[#allocation3 + $0x78] sm:$0xff] %v776_v54  ;;  %v771_v60 = vadd.f32 %v4432_v52, %v770_v57  ;;  %491 = vst [vmem:[#allocation2 + $0x50] sm:$0xff] %v475_v61  ;;  %v478_v2 = vmax.f32 %v452_v62, 0.0  ;;  %v447_v3 = vadd.f32 %v4439_v58, %v446_v0 }
 0x1a2   :  { %v3297_v63 = vpop.f32.mrf.mxu1  ;;  %v3268_v5 = vpop.f32.mrf.mxu0 }
 0x1a3   :  { %873 = vst [vmem:[#allocation3 + $0x70] sm:$0xff] %v771_v60  ;;  %v786_v1 = vadd.f32 %v3297_v63, %v4432_v52  ;;  %494 = vst [vmem:[#allocation2 + $0x68] sm:$0xff] %v478_v2  ;;  %v477_v7 = vmax.f32 %v447_v3, 0.0  ;;  %v462_v8 = vadd.f32 %v3268_v5, %v4439_v58 }
 0x1a4   :  { %v780_v4 = vpop.f32.mrf.mxu1  ;;  %v456_v10 = vpop.f32.mrf.mxu0 }
 0x1a5   :  { %876 = vst [vmem:[#allocation3 + $0x88] sm:$0xff] %v786_v1  ;;  %v781_v6 = vadd.f32 %v4432_v52, %v780_v4  ;;  %493 = vst [vmem:[#allocation2 + $0x60] sm:$0xff] %v477_v7  ;;  %v480_v12 = vmax.f32 %v462_v8, 0.0  ;;  %v457_v13 = vadd.f32 %v4439_v58, %v456_v10 }
 0x1a6   :  { %v3300_v9 = vpop.f32.mrf.mxu1 }
 0x1a7   :  { %875 = vst [vmem:[#allocation3 + $0x80] sm:$0xff] %v781_v6  ;;  %v796_v11 = vadd.f32 %v3300_v9, %v4432_v52  ;;  %496 = vst [vmem:[#allocation2 + $0x78] sm:$0xff] %v480_v12  ;;  %v479_v16 = vmax.f32 %v457_v13, 0.0 }
 0x1a8   :  { %v790_v14 = vpop.f32.mrf.mxu1 }
 0x1a9   :  { %878 = vst [vmem:[#allocation3 + $0x98] sm:$0xff] %v796_v11  ;;  %v791_v15 = vadd.f32 %v4432_v52, %v790_v14  ;;  %495 = vst [vmem:[#allocation2 + $0x70] sm:$0xff] %v479_v16 }
 0x1aa   :  { %v3303_v17 = vpop.f32.mrf.mxu1 }
 0x1ab   :  { %877 = vst [vmem:[#allocation3 + $0x90] sm:$0xff] %v791_v15  ;;  %v806_v18 = vadd.f32 %v3303_v17, %v4432_v52 }
 0x1ac   :  { %v800_v19 = vpop.f32.mrf.mxu1 }
 0x1ad   :  { %880 = vst [vmem:[#allocation3 + $0xa8] sm:$0xff] %v806_v18  ;;  %v801_v20 = vadd.f32 %v4432_v52, %v800_v19 }
 0x1ae   :  { %v3306_v21 = vpop.f32.mrf.mxu1 }
 0x1af   :  { %879 = vst [vmem:[#allocation3 + $0xa0] sm:$0xff] %v801_v20  ;;  %v816_v22 = vadd.f32 %v3306_v21, %v4432_v52 }
 0x1b0   :  { %v810_v58 = vpop.f32.mrf.mxu1 }
 0x1b1   :  { %882 = vst [vmem:[#allocation3 + $0xb8] sm:$0xff] %v816_v22  ;;  %v811_v23 = vadd.f32 %v4432_v52, %v810_v58 }
 0x1b2   :  { %v3309_v24 = vpop.f32.mrf.mxu1 }
 0x1b3   :  { %881 = vst [vmem:[#allocation3 + $0xb0] sm:$0xff] %v811_v23  ;;  %v826_v25 = vadd.f32 %v3309_v24, %v4432_v52 }
 0x1b4   :  { %v820_v26 = vpop.f32.mrf.mxu1 }
 0x1b5   :  { %884 = vst [vmem:[#allocation3 + $0xc8] sm:$0xff] %v826_v25  ;;  %v821_v27 = vadd.f32 %v4432_v52, %v820_v26 }
 0x1b6   :  { %v3312_v28 = vpop.f32.mrf.mxu1 }
 0x1b7   :  { %883 = vst [vmem:[#allocation3 + $0xc0] sm:$0xff] %v821_v27  ;;  %v836_v29 = vadd.f32 %v3312_v28, %v4432_v52 }
 0x1b8   :  { %v830_v30 = vpop.f32.mrf.mxu1 }
 0x1b9   :  { %886 = vst [vmem:[#allocation3 + $0xd8] sm:$0xff] %v836_v29  ;;  %v831_v31 = vadd.f32 %v4432_v52, %v830_v30 }
 0x1ba   :  { %v3315_v32 = vpop.f32.mrf.mxu1 }
 0x1bb   :  { %885 = vst [vmem:[#allocation3 + $0xd0] sm:$0xff] %v831_v31  ;;  %v846_v33 = vadd.f32 %v3315_v32, %v4432_v52 }
 0x1bc   :  { %v840_v34 = vpop.f32.mrf.mxu1 }
 0x1bd   :  { %888 = vst [vmem:[#allocation3 + $0xe8] sm:$0xff] %v846_v33  ;;  %v841_v35 = vadd.f32 %v4432_v52, %v840_v34 }
 0x1be   :  { %v3318_v36 = vpop.f32.mrf.mxu1 }
 0x1bf   :  { %887 = vst [vmem:[#allocation3 + $0xe0] sm:$0xff] %v841_v35  ;;  %v856_v37 = vadd.f32 %v3318_v36, %v4432_v52 }
 0x1c0   :  { %v850_v38 = vpop.f32.mrf.mxu1 }
 0x1c1   :  { %890 = vst [vmem:[#allocation3 + $0xf8] sm:$0xff] %v856_v37  ;;  %v851_v39 = vadd.f32 %v4432_v52, %v850_v38 }
 0x1c3   :  { %889 = vst [vmem:[#allocation3 + $0xf0] sm:$0xff] %v851_v39 }
 0x1c4 LB: > { %s913_s9 = sld [smem:[#allocation10 + %s4003_s7]]  ;;  %s917_s17 = scalar_lea.vmem [#allocation3], %s4003_s7  ;;  %s4003_s7 = sphi %s4001_s7, %s912_s7  }
 0x1c5   : > { %s914_s2 = sld [smem:[#allocation11 + %s4003_s7]]  ;;  %s912_s7 = sadd.s32 1, %s4003_s7  }
 0x1c6   : > { %p909_p9 = scmp.ge.s32.totalorder %s912_s7, 256  }
 0x1c7   :  { %v3643_v52 = vld [vmem:[%s4741_s10 + $0x38] sm:$0xff] (%p909_p9)   ;;  %v3644_v46 = vld [vmem:[%s4741_s10 + $0x30] sm:$0xff] (%p909_p9)   ;;  %v3645_v47 = vld [vmem:[%s4741_s10 + $0x28] sm:$0xff] (%p909_p9)   ;;  %s4005_s0 = smov (%p909_p9), 0  }
 0x1c8   :  { %3319 = vmatprep.subr.bf16.mxu0 (%p909_p9), %v3643_v52  ;;  %v3646_v48 = vld [vmem:[%s4741_s10 + $0x20] sm:$0xff] (%p909_p9)   ;;  %v926_v50 = vld [vmem:[#allocation2 + $0x8] sm:$0xff] (%p909_p9)  ;;  %v3647_v62 = vld [vmem:[%s4741_s10 + $0x18] sm:$0xff] (%p909_p9)  }
 0x1c9   :  { %3320 = vmatpush3.bf16.msra.mxu0 (%p909_p9), %v3643_v52  ;;  %v925_v49 = vld [vmem:[#allocation2] sm:$0xff] (%p909_p9)  ;;  %v3648_v6 = vld [vmem:[%s4741_s10 + $0x10] sm:$0xff] (%p909_p9)   ;;  %v3649_v9 = vld [vmem:[%s4741_s10 + $0x8] sm:$0xff] (%p909_p9)  }
 0x1ca   : > { %v918_v40 = vld [vmem:[%s917_s17] sm:$0x1]  ;;  %s915_s24 = scalar_lea.vmem [#allocation2], %s913_s9  ;;  %3321 = vmatprep.subr.bf16.mxu0 (%p909_p9), %v3644_v46  ;;  %v3651_v12 = vld [vmem:[%s4743_s12 + $0x38] sm:$0xff] (%p909_p9)   ;;  %v3652_v13 = vld [vmem:[%s4743_s12 + $0x30] sm:$0xff] (%p909_p9)  }
 0x1cb   : > { %v916_v41 = vld [vmem:[%s915_s24] sm:$0x1]  ;;  %s921_s14 = scalar_lea.vmem [#allocation4], %s914_s2  ;;  %v927_v14 = vld [vmem:[#allocation2 + $0x10] sm:$0xff] (%p909_p9)  ;;  %v928_v15 = vld [vmem:[#allocation2 + $0x18] sm:$0xff] (%p909_p9)  ;;  %3351 = vmatprep.subr.bf16.mxu1 (%p909_p9), %v3651_v12 }
 0x1cc   : > { %v919_v42 = vadd.f32 %v918_v40, %v916_v41  ;;  %v922_v43 = vld [vmem:[%s921_s14] sm:$0x1]  ;;  %v930_v18 = vld [vmem:[#allocation2 + $0x28] sm:$0xff] (%p909_p9)  ;;  %3352 = vmatpush3.bf16.msra.mxu1 (%p909_p9), %v3651_v12  ;;  %v931_v26 = vld [vmem:[#allocation2 + $0x30] sm:$0xff] (%p909_p9) }
 0x1cd   :  { %3322 = vmatpush3.bf16.msra.mxu0 (%p909_p9), %v3644_v46  ;;  %v3650_v16 = vld [vmem:[%s4741_s10] sm:$0xff] (%p909_p9)   ;;  %3353 = vmatprep.subr.bf16.mxu1 (%p909_p9), %v3652_v13  ;;  %v3653_v19 = vld [vmem:[%s4743_s12 + $0x28] sm:$0xff] (%p909_p9)   ;;  %v932_v27 = vld [vmem:[#allocation2 + $0x38] sm:$0xff] (%p909_p9) }
 0x1ce   : > { %v920_v44 = vmax.f32 %v919_v42, 0.0  ;;  %911 = sbr.rel (!%p909_p9) target bundleno = 452 (0x1c4), region = 211  ;;  %3323 = vmatprep.subr.bf16.mxu0 (%p909_p9), %v3645_v47  ;;  %v929_v17 = vld [vmem:[#allocation2 + $0x20] sm:$0xff] (%p909_p9)  ;;  %v3655_v28 = vld [vmem:[%s4743_s12 + $0x18] sm:$0xff] (%p909_p9)   ;;  %v934_v30 = vld [vmem:[#allocation2 + $0x48] sm:$0xff] (%p909_p9) }
 0x1cf   :  { %v3654_v23 = vld [vmem:[%s4743_s12 + $0x20] sm:$0xff] (%p909_p9)   ;;  %v935_v37 = vld [vmem:[#allocation2 + $0x50] sm:$0xff] (%p909_p9)  ;;  %v936_v38 = vld [vmem:[#allocation2 + $0x58] sm:$0xff] (%p909_p9) }
 0x1d0   : > { %v923_v45 = vadd.f32 %v922_v43, %v920_v44  ;;  %3354 = vmatpush3.bf16.msra.mxu1 (%p909_p9), %v3652_v13  ;;  %v933_v29 = vld [vmem:[#allocation2 + $0x40] sm:$0xff] (%p909_p9)  ;;  %v938_v40 = vld [vmem:[#allocation2 + $0x68] sm:$0xff] (%p909_p9)  ;;  %v939_v46 = vld [vmem:[#allocation2 + $0x70] sm:$0xff] (%p909_p9) }
 0x1d1   :  { %3324 = vmatpush3.bf16.msra.mxu0 (%p909_p9), %v3645_v47  ;;  %3355 = vmatprep.subr.bf16.mxu1 (%p909_p9), %v3653_v19  ;;  %v937_v39 = vld [vmem:[#allocation2 + $0x60] sm:$0xff] (%p909_p9)  ;;  %v940_v47 = vld [vmem:[#allocation2 + $0x78] sm:$0xff] (%p909_p9) }
 0x1d2   : > { %924 = vst [vmem:[%s921_s14] sm:$0x1] %v923_v45  ;;  %3325 = vmatprep.subr.bf16.mxu0 (%p909_p9), %v3646_v48 }
 0x1d4   :  { %3356 = vmatpush3.bf16.msra.mxu1 %v3653_v19 }
 0x1d5   :  { %3326 = vmatpush3.bf16.msra.mxu0 %v3646_v48  ;;  %3357 = vmatprep.subr.bf16.mxu1 %v3654_v23 }
 0x1d6   :  { %3327 = vmatprep.subr.bf16.mxu0 %v3647_v62 }
 0x1d8   :  { %3358 = vmatpush3.bf16.msra.mxu1 %v3654_v23 }
 0x1d9   :  { %v941_v53 = vld [vmem:[#allocation4] sm:$0xff]  ;;  %v942_v54 = vld [vmem:[#allocation4 + $0x8] sm:$0xff]  ;;  %v943_v57 = vld [vmem:[#allocation4 + $0x10] sm:$0xff]  ;;  %3328 = vmatpush3.bf16.msra.mxu0 %v3647_v62  ;;  %3359 = vmatprep.subr.bf16.mxu1 %v3655_v28 }
 0x1da   :  { %v957_v55 = vadd.f32 %v941_v53, %v925_v49  ;;  %1373 = vst [vmem:[#allocation4] sm:$0xff] %v4035_v51  ;;  %v958_v56 = vadd.f32 %v942_v54, %v926_v50  ;;  %1374 = vst [vmem:[#allocation4 + $0x8] sm:$0xff] %v4035_v51  ;;  %v944_v59 = vld [vmem:[#allocation4 + $0x18] sm:$0xff]  ;;  %v945_v60 = vld [vmem:[#allocation4 + $0x20] sm:$0xff]  ;;  %3329 = vmatprep.subr.bf16.mxu0 %v3648_v6  ;;  %v959_v20 = vadd.f32 %v943_v57, %v927_v14 }
 0x1db   :  { %1375 = vst [vmem:[#allocation4 + $0x10] sm:$0xff] %v4035_v51  ;;  %1376 = vst [vmem:[#allocation4 + $0x18] sm:$0xff] %v4035_v51  ;;  %v946_v61 = vld [vmem:[#allocation4 + $0x28] sm:$0xff]  ;;  %v947_v0 = vld [vmem:[#allocation4 + $0x30] sm:$0xff]  ;;  %v960_v21 = vadd.f32 %v944_v59, %v928_v15  ;;  %v961_v22 = vadd.f32 %v945_v60, %v929_v17 }
 0x1dc   :  { %v989_v63 = vpack.c.bf16 %v958_v56, %v957_v55  ;;  %1377 = vst [vmem:[#allocation4 + $0x20] sm:$0xff] %v4035_v51  ;;  %1378 = vst [vmem:[#allocation4 + $0x28] sm:$0xff] %v4035_v51  ;;  %v948_v1 = vld [vmem:[#allocation4 + $0x38] sm:$0xff]  ;;  %v949_v2 = vld [vmem:[#allocation4 + $0x40] sm:$0xff]  ;;  %v962_v58 = vadd.f32 %v946_v61, %v930_v18  ;;  %v963_v31 = vadd.f32 %v947_v0, %v931_v26  ;;  %3360 = vmatpush3.bf16.msra.mxu1 %v3655_v28 }
 0x1dd   :  { %1379 = vst [vmem:[#allocation4 + $0x30] sm:$0xff] %v4035_v51  ;;  %1380 = vst [vmem:[#allocation4 + $0x38] sm:$0xff] %v4035_v51  ;;  %v950_v3 = vld [vmem:[#allocation4 + $0x48] sm:$0xff]  ;;  %v4512_v4 = vld [vmem:[#allocation4 + $0x50] sm:$0xff]  ;;  %3330 = vmatpush3.bf16.msra.mxu0 %v3648_v6  ;;  %v990_v24 = vpack.c.bf16 %v960_v21, %v959_v20  ;;  %v964_v32 = vadd.f32 %v948_v1, %v932_v27  ;;  %v965_v33 = vadd.f32 %v949_v2, %v933_v29 }
 0x1de   :  { %3335 = vmatprep.mubr.bf16.mxu0 %v989_v63  ;;  %1381 = vst [vmem:[#allocation4 + $0x40] sm:$0xff] %v4035_v51  ;;  %1382 = vst [vmem:[#allocation4 + $0x48] sm:$0xff] %v4035_v51  ;;  %v4514_v5 = vld [vmem:[#allocation4 + $0x58] sm:$0xff]  ;;  %v953_v7 = vld [vmem:[#allocation4 + $0x60] sm:$0xff]  ;;  %3331 = vmatprep.subr.bf16.mxu0 %v3649_v9  ;;  %v991_v25 = vpack.c.bf16 %v962_v58, %v961_v22  ;;  %v966_v34 = vadd.f32 %v950_v3, %v934_v30 }
 0x1df   :  { %1383 = vst [vmem:[#allocation4 + $0x50] sm:$0xff] %v4035_v51  ;;  %1384 = vst [vmem:[#allocation4 + $0x58] sm:$0xff] %v4035_v51  ;;  %v954_v8 = vld [vmem:[#allocation4 + $0x68] sm:$0xff]  ;;  %v4526_v10 = vld [vmem:[#allocation4 + $0x70] sm:$0xff]  ;;  %v992_v35 = vpack.c.bf16 %v964_v32, %v963_v31  ;;  %v967_v41 = vadd.f32 %v4512_v4, %v935_v37  ;;  %v968_v42 = vadd.f32 %v4514_v5, %v936_v38 }
 0x1e0   :  { %1385 = vst [vmem:[#allocation4 + $0x60] sm:$0xff] %v4035_v51  ;;  %1386 = vst [vmem:[#allocation4 + $0x68] sm:$0xff] %v4035_v51  ;;  %v4528_v11 = vld [vmem:[#allocation4 + $0x78] sm:$0xff]  ;;  %v993_v36 = vpack.c.bf16 %v966_v34, %v965_v33  ;;  %v969_v43 = vadd.f32 %v953_v7, %v937_v39  ;;  %v970_v44 = vadd.f32 %v954_v8, %v938_v40  ;;  %v3656_v53 = vld [vmem:[%s4743_s12 + $0x10] sm:$0xff]  }
 0x1e1   :  { %1387 = vst [vmem:[#allocation4 + $0x70] sm:$0xff] %v4035_v51  ;;  %1388 = vst [vmem:[#allocation4 + $0x78] sm:$0xff] %v4035_v51  ;;  %3332 = vmatpush3.bf16.msra.mxu0 %v3649_v9  ;;  %v994_v45 = vpack.c.bf16 %v968_v42, %v967_v41  ;;  %v971_v48 = vadd.f32 %v4526_v10, %v939_v46  ;;  %v972_v49 = vadd.f32 %v4528_v11, %v940_v47  ;;  %v3657_v54 = vld [vmem:[%s4743_s12 + $0x8] sm:$0xff]   ;;  %v3658_v55 = vld [vmem:[%s4743_s12] sm:$0xff]  }
 0x1e2   :  { %3333 = vmatprep.subr.bf16.mxu0 %v3650_v16  ;;  %v995_v52 = vpack.c.bf16 %v970_v44, %v969_v43  ;;  %3361 = vmatprep.subr.bf16.mxu1 %v3656_v53  ;;  %v2902_v59 = vld [vmem:[#allocation14] ss:$0 sm:$0xff] }
 0x1e3   :  { %v996_v50 = vpack.c.bf16 %v972_v49, %v971_v48  ;;  %3362 = vmatpush3.bf16.msra.mxu1 %v3656_v53  ;;  %v2911_v48 = vld [vmem:[#allocation15] ss:$0 sm:$0xff] }
 0x1e4   :  { %3363 = vmatprep.subr.bf16.mxu1 %v3657_v54 }
 0x1e5   :  { %3334 = vmatpush3.bf16.msra.mxu0 %v3650_v16 }
 0x1e7   :  { %3364 = vmatpush3.bf16.msra.mxu1 %v3657_v54 }
 0x1e8   :  { %3336 = vmatmul.mubr.bf16.vlgmr.msra.gmra.mxu0 %v990_v24  ;;  %3365 = vmatprep.subr.bf16.mxu1 %v3658_v55 }
 0x1e9   :  { %3339 = vmatprep.mubr.bf16.mxu0 %v991_v25 }
 0x1eb   :  { %3366 = vmatpush3.bf16.msra.mxu1 %v3658_v55 }
 0x1f0   :  { %3340 = vmatmul.mubr.bf16.gmra.mxu0 %v992_v35 }
 0x1f1   :  { %3343 = vmatprep.mubr.bf16.mxu0 %v993_v36 }
 0x1f8   :  { %3344 = vmatmul.mubr.bf16.gmra.mxu0 %v994_v45 }
 0x1f9   :  { %3347 = vmatprep.mubr.bf16.mxu0 %v995_v52 }
 0x200   :  { %3348 = vmatmul.mubr.bf16.gmra.mxu0 %v996_v50 }
 0x2a8   :  { %v3337_v56 = vpop.f32.mrf.mxu0 }
 0x2a9   :  { %v1095_v63 = vadd.f32 %v3337_v56, %v2902_v59 }
 0x2aa   :  { %v1086_v57 = vpop.f32.mrf.mxu0 }
 0x2ab   :  { %v1087_v61 = vadd.f32 %v2902_v59, %v1086_v57  ;;  %v1151_v6 = vmax.f32 %v1095_v63, 0.0 }
 0x2ac   :  { %v3338_v60 = vpop.f32.mrf.mxu0 }
 0x2ad   :  { %v1098_v62 = vadd.f32 %v3338_v60, %v2902_v59  ;;  %v1149_v4 = vmax.f32 %v1087_v61, 0.0 }
 0x2ae   :  { %v1089_v0 = vpop.f32.mrf.mxu0 }
 0x2af   :  { %v1090_v1 = vadd.f32 %v2902_v59, %v1089_v0  ;;  %v1152_v2 = vmax.f32 %v1098_v62, 0.0 }
 0x2b0   :  { %v3341_v3 = vpop.f32.mrf.mxu0 }
 0x2b1   :  { %v1150_v5 = vmax.f32 %v1090_v1, 0.0  ;;  %v1182_v9 = vpack.c.bf16 %v1152_v2, %v1151_v6  ;;  %v1111_v13 = vadd.f32 %v3341_v3, %v2902_v59 }
 0x2b2   :  { %v1102_v7 = vpop.f32.mrf.mxu0 }
 0x2b3   :  { %v1181_v8 = vpack.c.bf16 %v1150_v5, %v1149_v4  ;;  %v1103_v11 = vadd.f32 %v2902_v59, %v1102_v7  ;;  %v1155_v20 = vmax.f32 %v1111_v13, 0.0 }
 0x2b4   :  { %v3342_v10 = vpop.f32.mrf.mxu0 }
 0x2b5   :  { %v1114_v12 = vadd.f32 %v3342_v10, %v2902_v59  ;;  %3367 = vmatprep.mubr.bf16.mxu1 %v1181_v8  ;;  %v1153_v18 = vmax.f32 %v1103_v11, 0.0 }
 0x2b6   :  { %v1105_v14 = vpop.f32.mrf.mxu0  ;;  %3368 = vmatmul.mubr.bf16.vlgmr.msra.gmra.mxu1 %v1182_v9 }
 0x2b7   :  { %v1106_v15 = vadd.f32 %v2902_v59, %v1105_v14  ;;  %v1156_v16 = vmax.f32 %v1114_v12, 0.0 }
 0x2b8   :  { %v3345_v17 = vpop.f32.mrf.mxu0 }
 0x2b9   :  { %v1154_v19 = vmax.f32 %v1106_v15, 0.0  ;;  %v1184_v58 = vpack.c.bf16 %v1156_v16, %v1155_v20  ;;  %v1127_v26 = vadd.f32 %v3345_v17, %v2902_v59 }
 0x2ba   :  { %v1118_v21 = vpop.f32.mrf.mxu0 }
 0x2bb   :  { %v1183_v22 = vpack.c.bf16 %v1154_v19, %v1153_v18  ;;  %v1119_v24 = vadd.f32 %v2902_v59, %v1118_v21  ;;  %v1159_v33 = vmax.f32 %v1127_v26, 0.0 }
 0x2bc   :  { %v3346_v23 = vpop.f32.mrf.mxu0 }
 0x2bd   :  { %v1130_v25 = vadd.f32 %v3346_v23, %v2902_v59  ;;  %3371 = vmatprep.mubr.bf16.mxu1 %v1183_v22  ;;  %v1157_v31 = vmax.f32 %v1119_v24, 0.0 }
 0x2be   :  { %v1121_v27 = vpop.f32.mrf.mxu0  ;;  %3372 = vmatmul.mubr.bf16.gmra.mxu1 %v1184_v58 }
 0x2bf   :  { %v1122_v28 = vadd.f32 %v2902_v59, %v1121_v27  ;;  %v1160_v29 = vmax.f32 %v1130_v25, 0.0 }
 0x2c0   :  { %v3349_v30 = vpop.f32.mrf.mxu0 }
 0x2c1   :  { %v1158_v32 = vmax.f32 %v1122_v28, 0.0  ;;  %v1186_v36 = vpack.c.bf16 %v1160_v29, %v1159_v33  ;;  %v1143_v40 = vadd.f32 %v3349_v30, %v2902_v59 }
 0x2c2   :  { %v1134_v34 = vpop.f32.mrf.mxu0 }
 0x2c3   :  { %v1185_v35 = vpack.c.bf16 %v1158_v32, %v1157_v31  ;;  %v1135_v38 = vadd.f32 %v2902_v59, %v1134_v34  ;;  %v1163_v52 = vmax.f32 %v1143_v40, 0.0 }
 0x2c4   :  { %v3350_v37 = vpop.f32.mrf.mxu0 }
 0x2c5   :  { %v1146_v39 = vadd.f32 %v3350_v37, %v2902_v59  ;;  %3375 = vmatprep.mubr.bf16.mxu1 %v1185_v35  ;;  %v1161_v44 = vmax.f32 %v1135_v38, 0.0 }
 0x2c6   :  { %v1137_v41 = vpop.f32.mrf.mxu0  ;;  %3376 = vmatmul.mubr.bf16.gmra.mxu1 %v1186_v36 }
 0x2c7   :  { %v1138_v42 = vadd.f32 %v2902_v59, %v1137_v41  ;;  %v1164_v43 = vmax.f32 %v1146_v39, 0.0 }
 0x2c9   :  { %v1162_v45 = vmax.f32 %v1138_v42, 0.0  ;;  %v1188_v47 = vpack.c.bf16 %v1164_v43, %v1163_v52 }
 0x2cb   :  { %v1187_v46 = vpack.c.bf16 %v1162_v45, %v1161_v44 }
 0x2cd   :  { %3379 = vmatprep.mubr.bf16.mxu1 %v1187_v46 }
 0x2ce   :  { %3380 = vmatmul.mubr.bf16.gmra.mxu1 %v1188_v47 }
 0x376   :  { %v3369_v49 = vpop.f32.mrf.mxu1 }
 0x377   :  { %v1287_v50 = vadd.f32 %v3369_v49, %v2911_v48 }
 0x378   :  { %v1278_v53 = vpop.f32.mrf.mxu1 }
 0x379   :  { %v1343_v54 = vmax.f32 %v1287_v50, 0.0  ;;  %v1279_v55 = vadd.f32 %v2911_v48, %v1278_v53 }
 0x37a   :  { %v3370_v56 = vpop.f32.mrf.mxu1 }
 0x37b   :  { %1359 = vst [vmem:[#allocation2 + $0x10] sm:$0xff] %v1343_v54  ;;  %v1341_v57 = vmax.f32 %v1279_v55, 0.0  ;;  %v1290_v60 = vadd.f32 %v3370_v56, %v2911_v48 }
 0x37c   :  { %v1281_v61 = vpop.f32.mrf.mxu1 }
 0x37d   :  { %1357 = vst [vmem:[#allocation2] sm:$0xff] %v1341_v57  ;;  %v1344_v59 = vmax.f32 %v1290_v60, 0.0  ;;  %v1282_v62 = vadd.f32 %v2911_v48, %v1281_v61 }
 0x37e   :  { %v3373_v63 = vpop.f32.mrf.mxu1 }
 0x37f   :  { %1360 = vst [vmem:[#allocation2 + $0x18] sm:$0xff] %v1344_v59  ;;  %v1342_v0 = vmax.f32 %v1282_v62, 0.0  ;;  %v1303_v1 = vadd.f32 %v3373_v63, %v2911_v48 }
 0x380   :  { %v1294_v2 = vpop.f32.mrf.mxu1 }
 0x381   :  { %1358 = vst [vmem:[#allocation2 + $0x8] sm:$0xff] %v1342_v0  ;;  %v1347_v3 = vmax.f32 %v1303_v1, 0.0  ;;  %v1295_v4 = vadd.f32 %v2911_v48, %v1294_v2 }
 0x382   :  { %v3374_v5 = vpop.f32.mrf.mxu1 }
 0x383   :  { %1363 = vst [vmem:[#allocation2 + $0x30] sm:$0xff] %v1347_v3  ;;  %v1345_v6 = vmax.f32 %v1295_v4, 0.0  ;;  %v1306_v7 = vadd.f32 %v3374_v5, %v2911_v48 }
 0x384   :  { %v1297_v8 = vpop.f32.mrf.mxu1 }
 0x385   :  { %1361 = vst [vmem:[#allocation2 + $0x20] sm:$0xff] %v1345_v6  ;;  %v1348_v9 = vmax.f32 %v1306_v7, 0.0  ;;  %v1298_v10 = vadd.f32 %v2911_v48, %v1297_v8 }
 0x386   :  { %v3377_v11 = vpop.f32.mrf.mxu1 }
 0x387   :  { %1364 = vst [vmem:[#allocation2 + $0x38] sm:$0xff] %v1348_v9  ;;  %v1346_v12 = vmax.f32 %v1298_v10, 0.0  ;;  %v1319_v13 = vadd.f32 %v3377_v11, %v2911_v48 }
 0x388   :  { %v1310_v14 = vpop.f32.mrf.mxu1 }
 0x389   :  { %1362 = vst [vmem:[#allocation2 + $0x28] sm:$0xff] %v1346_v12  ;;  %v1351_v15 = vmax.f32 %v1319_v13, 0.0  ;;  %v1311_v16 = vadd.f32 %v2911_v48, %v1310_v14 }
 0x38a   :  { %v3378_v17 = vpop.f32.mrf.mxu1 }
 0x38b   :  { %1367 = vst [vmem:[#allocation2 + $0x50] sm:$0xff] %v1351_v15  ;;  %v1349_v18 = vmax.f32 %v1311_v16, 0.0  ;;  %v1322_v19 = vadd.f32 %v3378_v17, %v2911_v48 }
 0x38c   :  { %v1313_v20 = vpop.f32.mrf.mxu1 }
 0x38d   :  { %1365 = vst [vmem:[#allocation2 + $0x40] sm:$0xff] %v1349_v18  ;;  %v1352_v21 = vmax.f32 %v1322_v19, 0.0  ;;  %v1314_v22 = vadd.f32 %v2911_v48, %v1313_v20 }
 0x38e   :  { %v3381_v58 = vpop.f32.mrf.mxu1 }
 0x38f   :  { %1368 = vst [vmem:[#allocation2 + $0x58] sm:$0xff] %v1352_v21  ;;  %v1350_v23 = vmax.f32 %v1314_v22, 0.0  ;;  %v1335_v24 = vadd.f32 %v3381_v58, %v2911_v48 }
 0x390   :  { %v1326_v25 = vpop.f32.mrf.mxu1 }
 0x391   :  { %1366 = vst [vmem:[#allocation2 + $0x48] sm:$0xff] %v1350_v23  ;;  %v1355_v26 = vmax.f32 %v1335_v24, 0.0  ;;  %v1327_v27 = vadd.f32 %v2911_v48, %v1326_v25 }
 0x392   :  { %v3382_v28 = vpop.f32.mrf.mxu1 }
 0x393   :  { %1371 = vst [vmem:[#allocation2 + $0x70] sm:$0xff] %v1355_v26  ;;  %v1353_v29 = vmax.f32 %v1327_v27, 0.0  ;;  %v1338_v30 = vadd.f32 %v3382_v28, %v2911_v48 }
 0x394   :  { %v1329_v31 = vpop.f32.mrf.mxu1 }
 0x395   :  { %1369 = vst [vmem:[#allocation2 + $0x60] sm:$0xff] %v1353_v29  ;;  %v1356_v32 = vmax.f32 %v1338_v30, 0.0  ;;  %v1330_v33 = vadd.f32 %v2911_v48, %v1329_v31 }
 0x397   :  { %1372 = vst [vmem:[#allocation2 + $0x78] sm:$0xff] %v1356_v32  ;;  %v1354_v34 = vmax.f32 %v1330_v33, 0.0 }
 0x399   :  { %1370 = vst [vmem:[#allocation2 + $0x68] sm:$0xff] %v1354_v34 }
 0x39a LB: > { %s1395_s5 = sld [smem:[#allocation10 + %s4007_s0]]  ;;  %s1399_s23 = scalar_lea.vmem [#allocation3], %s4007_s0  ;;  %s4007_s0 = sphi %s4005_s0, %s1394_s0  }
 0x39b   : > { %s1396_s16 = sld [smem:[#allocation11 + %s4007_s0]]  ;;  %v1400_v35 = vld [vmem:[%s1399_s23] sm:$0x1]  ;;  %s1394_s0 = sadd.s32 1, %s4007_s0  }
 0x39c   : > { %p1391_p10 = scmp.ge.s32.totalorder %s1394_s0, 256  }
 0x39d   :  { %v3659_v41 = vld [vmem:[%s4741_s10 + $0x78] sm:$0xff] (%p1391_p10)   ;;  %v3660_v42 = vld [vmem:[%s4741_s10 + $0x70] sm:$0xff] (%p1391_p10)   ;;  %v3661_v43 = vld [vmem:[%s4741_s10 + $0x68] sm:$0xff] (%p1391_p10)   ;;  %s4009_s13 = smov (%p1391_p10), 0  }
 0x39e   :  { %3383 = vmatprep.subr.bf16.mxu0 (%p1391_p10), %v3659_v41  ;;  %v3662_v44 = vld [vmem:[%s4741_s10 + $0x60] sm:$0xff] (%p1391_p10)   ;;  %v1408_v52 = vld [vmem:[#allocation2 + $0x8] sm:$0xff] (%p1391_p10)  ;;  %v3663_v56 = vld [vmem:[%s4741_s10 + $0x58] sm:$0xff] (%p1391_p10)  }
 0x39f   :  { %3384 = vmatpush3.bf16.msra.mxu0 (%p1391_p10), %v3659_v41  ;;  %v1407_v45 = vld [vmem:[#allocation2] sm:$0xff] (%p1391_p10)  ;;  %v3664_v1 = vld [vmem:[%s4741_s10 + $0x50] sm:$0xff] (%p1391_p10)   ;;  %v3665_v4 = vld [vmem:[%s4741_s10 + $0x48] sm:$0xff] (%p1391_p10)  }
 0x3a0   : > { %s1397_s18 = scalar_lea.vmem [#allocation2], %s1395_s5  ;;  %3385 = vmatprep.subr.bf16.mxu0 (%p1391_p10), %v3660_v42  ;;  %v3667_v7 = vld [vmem:[%s4743_s12 + $0x78] sm:$0xff] (%p1391_p10)   ;;  %v3668_v8 = vld [vmem:[%s4743_s12 + $0x70] sm:$0xff] (%p1391_p10)   ;;  %v3666_v11 = vld [vmem:[%s4741_s10 + $0x40] sm:$0xff] (%p1391_p10)  }
 0x3a1   : > { %v1398_v36 = vld [vmem:[%s1397_s18] sm:$0x1]  ;;  %s1403_s25 = scalar_lea.vmem [#allocation4], %s1396_s16  ;;  %v1409_v9 = vld [vmem:[#allocation2 + $0x10] sm:$0xff] (%p1391_p10)  ;;  %v1410_v10 = vld [vmem:[#allocation2 + $0x18] sm:$0xff] (%p1391_p10)  ;;  %3415 = vmatprep.subr.bf16.mxu1 (%p1391_p10), %v3667_v7 }
 0x3a2   : > { %v1401_v37 = vadd.f32 %v1400_v35, %v1398_v36  ;;  %v1404_v38 = vld [vmem:[%s1403_s25] sm:$0x1]  ;;  %v1412_v13 = vld [vmem:[#allocation2 + $0x28] sm:$0xff] (%p1391_p10)  ;;  %3416 = vmatpush3.bf16.msra.mxu1 (%p1391_p10), %v3667_v7  ;;  %v1413_v22 = vld [vmem:[#allocation2 + $0x30] sm:$0xff] (%p1391_p10) }
 0x3a3   :  { %3386 = vmatpush3.bf16.msra.mxu0 (%p1391_p10), %v3660_v42  ;;  %v1411_v12 = vld [vmem:[#allocation2 + $0x20] sm:$0xff] (%p1391_p10)  ;;  %3417 = vmatprep.subr.bf16.mxu1 (%p1391_p10), %v3668_v8  ;;  %v3669_v14 = vld [vmem:[%s4743_s12 + $0x68] sm:$0xff] (%p1391_p10)   ;;  %v1414_v58 = vld [vmem:[#allocation2 + $0x38] sm:$0xff] (%p1391_p10) }
 0x3a4   : > { %v1402_v39 = vmax.f32 %v1401_v37, 0.0  ;;  %1393 = sbr.rel (!%p1391_p10) target bundleno = 922 (0x39a), region = 222  ;;  %3387 = vmatprep.subr.bf16.mxu0 (%p1391_p10), %v3661_v43  ;;  %v3670_v19 = vld [vmem:[%s4743_s12 + $0x60] sm:$0xff] (%p1391_p10)   ;;  %v3671_v23 = vld [vmem:[%s4743_s12 + $0x58] sm:$0xff] (%p1391_p10)   ;;  %v1416_v25 = vld [vmem:[#allocation2 + $0x48] sm:$0xff] (%p1391_p10) }
 0x3a5   :  { %v1415_v24 = vld [vmem:[#allocation2 + $0x40] sm:$0xff] (%p1391_p10)  ;;  %v1417_v32 = vld [vmem:[#allocation2 + $0x50] sm:$0xff] (%p1391_p10)  ;;  %v1418_v33 = vld [vmem:[#allocation2 + $0x58] sm:$0xff] (%p1391_p10) }
 0x3a6   : > { %v1405_v40 = vadd.f32 %v1404_v38, %v1402_v39  ;;  %3418 = vmatpush3.bf16.msra.mxu1 (%p1391_p10), %v3668_v8  ;;  %v1419_v34 = vld [vmem:[#allocation2 + $0x60] sm:$0xff] (%p1391_p10)  ;;  %v1420_v35 = vld [vmem:[#allocation2 + $0x68] sm:$0xff] (%p1391_p10)  ;;  %v1421_v42 = vld [vmem:[#allocation2 + $0x70] sm:$0xff] (%p1391_p10) }
 0x3a7   :  { %3388 = vmatpush3.bf16.msra.mxu0 (%p1391_p10), %v3661_v43  ;;  %3419 = vmatprep.subr.bf16.mxu1 (%p1391_p10), %v3669_v14  ;;  %v1422_v43 = vld [vmem:[#allocation2 + $0x78] sm:$0xff] (%p1391_p10) }
 0x3a8   : > { %1406 = vst [vmem:[%s1403_s25] sm:$0x1] %v1405_v40  ;;  %3389 = vmatprep.subr.bf16.mxu0 (%p1391_p10), %v3662_v44 }
 0x3aa   :  { %3420 = vmatpush3.bf16.msra.mxu1 %v3669_v14 }
 0x3ab   :  { %3390 = vmatpush3.bf16.msra.mxu0 %v3662_v44  ;;  %3421 = vmatprep.subr.bf16.mxu1 %v3670_v19 }
 0x3ac   :  { %3391 = vmatprep.subr.bf16.mxu0 %v3663_v56 }
 0x3ae   :  { %3422 = vmatpush3.bf16.msra.mxu1 %v3670_v19 }
 0x3af   :  { %v1423_v46 = vld [vmem:[#allocation4] sm:$0xff]  ;;  %v1424_v47 = vld [vmem:[#allocation4 + $0x8] sm:$0xff]  ;;  %v1425_v50 = vld [vmem:[#allocation4 + $0x10] sm:$0xff]  ;;  %3392 = vmatpush3.bf16.msra.mxu0 %v3663_v56  ;;  %3423 = vmatprep.subr.bf16.mxu1 %v3671_v23 }
 0x3b0   :  { %v1439_v48 = vadd.f32 %v1423_v46, %v1407_v45  ;;  %1859 = vst [vmem:[#allocation4] sm:$0xff] %v4035_v51  ;;  %v1440_v49 = vadd.f32 %v1424_v47, %v1408_v52  ;;  %1860 = vst [vmem:[#allocation4 + $0x8] sm:$0xff] %v4035_v51  ;;  %v1426_v53 = vld [vmem:[#allocation4 + $0x18] sm:$0xff]  ;;  %v1427_v54 = vld [vmem:[#allocation4 + $0x20] sm:$0xff]  ;;  %3393 = vmatprep.subr.bf16.mxu0 %v3664_v1  ;;  %v1441_v15 = vadd.f32 %v1425_v50, %v1409_v9 }
 0x3b1   :  { %1861 = vst [vmem:[#allocation4 + $0x10] sm:$0xff] %v4035_v51  ;;  %1862 = vst [vmem:[#allocation4 + $0x18] sm:$0xff] %v4035_v51  ;;  %v1428_v55 = vld [vmem:[#allocation4 + $0x28] sm:$0xff]  ;;  %v1429_v60 = vld [vmem:[#allocation4 + $0x30] sm:$0xff]  ;;  %v1442_v16 = vadd.f32 %v1426_v53, %v1410_v10  ;;  %v1443_v17 = vadd.f32 %v1427_v54, %v1411_v12 }
 0x3b2   :  { %v1472_v57 = vpack.c.bf16 %v1440_v49, %v1439_v48  ;;  %1863 = vst [vmem:[#allocation4 + $0x20] sm:$0xff] %v4035_v51  ;;  %1864 = vst [vmem:[#allocation4 + $0x28] sm:$0xff] %v4035_v51  ;;  %v1430_v61 = vld [vmem:[#allocation4 + $0x38] sm:$0xff]  ;;  %v1431_v59 = vld [vmem:[#allocation4 + $0x40] sm:$0xff]  ;;  %v1444_v18 = vadd.f32 %v1428_v55, %v1412_v13  ;;  %v1445_v26 = vadd.f32 %v1429_v60, %v1413_v22  ;;  %3424 = vmatpush3.bf16.msra.mxu1 %v3671_v23 }
 0x3b3   :  { %1865 = vst [vmem:[#allocation4 + $0x30] sm:$0xff] %v4035_v51  ;;  %1866 = vst [vmem:[#allocation4 + $0x38] sm:$0xff] %v4035_v51  ;;  %v1432_v62 = vld [vmem:[#allocation4 + $0x48] sm:$0xff]  ;;  %v4588_v63 = vld [vmem:[#allocation4 + $0x50] sm:$0xff]  ;;  %3394 = vmatpush3.bf16.msra.mxu0 %v3664_v1  ;;  %v1473_v20 = vpack.c.bf16 %v1442_v16, %v1441_v15  ;;  %v1446_v27 = vadd.f32 %v1430_v61, %v1414_v58  ;;  %v1447_v28 = vadd.f32 %v1431_v59, %v1415_v24 }
 0x3b4   :  { %3399 = vmatprep.mubr.bf16.mxu0 %v1472_v57  ;;  %1867 = vst [vmem:[#allocation4 + $0x40] sm:$0xff] %v4035_v51  ;;  %1868 = vst [vmem:[#allocation4 + $0x48] sm:$0xff] %v4035_v51  ;;  %v4590_v0 = vld [vmem:[#allocation4 + $0x58] sm:$0xff]  ;;  %v1435_v2 = vld [vmem:[#allocation4 + $0x60] sm:$0xff]  ;;  %3395 = vmatprep.subr.bf16.mxu0 %v3665_v4  ;;  %v1474_v21 = vpack.c.bf16 %v1444_v18, %v1443_v17  ;;  %v1448_v29 = vadd.f32 %v1432_v62, %v1416_v25 }
 0x3b5   :  { %1869 = vst [vmem:[#allocation4 + $0x50] sm:$0xff] %v4035_v51  ;;  %1870 = vst [vmem:[#allocation4 + $0x58] sm:$0xff] %v4035_v51  ;;  %v1436_v3 = vld [vmem:[#allocation4 + $0x68] sm:$0xff]  ;;  %v4602_v5 = vld [vmem:[#allocation4 + $0x70] sm:$0xff]  ;;  %v1475_v30 = vpack.c.bf16 %v1446_v27, %v1445_v26  ;;  %v1449_v36 = vadd.f32 %v4588_v63, %v1417_v32  ;;  %v1450_v37 = vadd.f32 %v4590_v0, %v1418_v33 }
 0x3b6   :  { %1871 = vst [vmem:[#allocation4 + $0x60] sm:$0xff] %v4035_v51  ;;  %1872 = vst [vmem:[#allocation4 + $0x68] sm:$0xff] %v4035_v51  ;;  %v4604_v6 = vld [vmem:[#allocation4 + $0x78] sm:$0xff]  ;;  %v1476_v31 = vpack.c.bf16 %v1448_v29, %v1447_v28  ;;  %v1451_v38 = vadd.f32 %v1435_v2, %v1419_v34  ;;  %v1452_v39 = vadd.f32 %v1436_v3, %v1420_v35  ;;  %v3672_v46 = vld [vmem:[%s4743_s12 + $0x50] sm:$0xff]  }
 0x3b7   :  { %1873 = vst [vmem:[#allocation4 + $0x70] sm:$0xff] %v4035_v51  ;;  %1874 = vst [vmem:[#allocation4 + $0x78] sm:$0xff] %v4035_v51  ;;  %3396 = vmatpush3.bf16.msra.mxu0 %v3665_v4  ;;  %v1477_v40 = vpack.c.bf16 %v1450_v37, %v1449_v36  ;;  %v1453_v44 = vadd.f32 %v4602_v5, %v1421_v42  ;;  %v1454_v45 = vadd.f32 %v4604_v6, %v1422_v43  ;;  %v3673_v47 = vld [vmem:[%s4743_s12 + $0x48] sm:$0xff]   ;;  %v3674_v48 = vld [vmem:[%s4743_s12 + $0x40] sm:$0xff]  }
 0x3b8   :  { %3397 = vmatprep.subr.bf16.mxu0 %v3666_v11  ;;  %v1478_v41 = vpack.c.bf16 %v1452_v39, %v1451_v38  ;;  %3425 = vmatprep.subr.bf16.mxu1 %v3672_v46  ;;  %v2936_v53 = vld [vmem:[#allocation14 + $0x1] ss:$0 sm:$0xff] }
 0x3b9   :  { %v1479_v52 = vpack.c.bf16 %v1454_v45, %v1453_v44  ;;  %3426 = vmatpush3.bf16.msra.mxu1 %v3672_v46  ;;  %v2961_v44 = vld [vmem:[#allocation15 + $0x1] ss:$0 sm:$0xff] }
 0x3ba   :  { %3427 = vmatprep.subr.bf16.mxu1 %v3673_v47 }
 0x3bb   :  { %3398 = vmatpush3.bf16.msra.mxu0 %v3666_v11 }
 0x3bd   :  { %3428 = vmatpush3.bf16.msra.mxu1 %v3673_v47 }
 0x3be   :  { %3400 = vmatmul.mubr.bf16.vlgmr.msra.gmra.mxu0 %v1473_v20  ;;  %3429 = vmatprep.subr.bf16.mxu1 %v3674_v48 }
 0x3bf   :  { %3403 = vmatprep.mubr.bf16.mxu0 %v1474_v21 }
 0x3c1   :  { %3430 = vmatpush3.bf16.msra.mxu1 %v3674_v48 }
 0x3c6   :  { %3404 = vmatmul.mubr.bf16.gmra.mxu0 %v1475_v30 }
 0x3c7   :  { %3407 = vmatprep.mubr.bf16.mxu0 %v1476_v31 }
 0x3ce   :  { %3408 = vmatmul.mubr.bf16.gmra.mxu0 %v1477_v40 }
 0x3cf   :  { %3411 = vmatprep.mubr.bf16.mxu0 %v1478_v41 }
 0x3d6   :  { %3412 = vmatmul.mubr.bf16.gmra.mxu0 %v1479_v52 }
 0x47e   :  { %v3401_v49 = vpop.f32.mrf.mxu0 }
 0x47f   :  { %v1579_v57 = vadd.f32 %v3401_v49, %v2936_v53 }
 0x480   :  { %v1570_v50 = vpop.f32.mrf.mxu0 }
 0x481   :  { %v1571_v55 = vadd.f32 %v2936_v53, %v1570_v50  ;;  %v1635_v1 = vmax.f32 %v1579_v57, 0.0 }
 0x482   :  { %v3402_v54 = vpop.f32.mrf.mxu0 }
 0x483   :  { %v1582_v56 = vadd.f32 %v3402_v54, %v2936_v53  ;;  %v1633_v63 = vmax.f32 %v1571_v55, 0.0 }
 0x484   :  { %v1573_v60 = vpop.f32.mrf.mxu0 }
 0x485   :  { %v1574_v61 = vadd.f32 %v2936_v53, %v1573_v60  ;;  %v1636_v59 = vmax.f32 %v1582_v56, 0.0 }
 0x486   :  { %v3405_v62 = vpop.f32.mrf.mxu0 }
 0x487   :  { %v1634_v0 = vmax.f32 %v1574_v61, 0.0  ;;  %v1667_v4 = vpack.c.bf16 %v1636_v59, %v1635_v1  ;;  %v1595_v8 = vadd.f32 %v3405_v62, %v2936_v53 }
 0x488   :  { %v1586_v2 = vpop.f32.mrf.mxu0 }
 0x489   :  { %v1666_v3 = vpack.c.bf16 %v1634_v0, %v1633_v63  ;;  %v1587_v6 = vadd.f32 %v2936_v53, %v1586_v2  ;;  %v1639_v15 = vmax.f32 %v1595_v8, 0.0 }
 0x48a   :  { %v3406_v5 = vpop.f32.mrf.mxu0 }
 0x48b   :  { %v1598_v7 = vadd.f32 %v3406_v5, %v2936_v53  ;;  %3431 = vmatprep.mubr.bf16.mxu1 %v1666_v3  ;;  %v1637_v13 = vmax.f32 %v1587_v6, 0.0 }
 0x48c   :  { %v1589_v9 = vpop.f32.mrf.mxu0  ;;  %3432 = vmatmul.mubr.bf16.vlgmr.msra.gmra.mxu1 %v1667_v4 }
 0x48d   :  { %v1590_v10 = vadd.f32 %v2936_v53, %v1589_v9  ;;  %v1640_v11 = vmax.f32 %v1598_v7, 0.0 }
 0x48e   :  { %v3409_v12 = vpop.f32.mrf.mxu0 }
 0x48f   :  { %v1638_v14 = vmax.f32 %v1590_v10, 0.0  ;;  %v1669_v18 = vpack.c.bf16 %v1640_v11, %v1639_v15  ;;  %v1611_v22 = vadd.f32 %v3409_v12, %v2936_v53 }
 0x490   :  { %v1602_v16 = vpop.f32.mrf.mxu0 }
 0x491   :  { %v1668_v17 = vpack.c.bf16 %v1638_v14, %v1637_v13  ;;  %v1603_v20 = vadd.f32 %v2936_v53, %v1602_v16  ;;  %v1643_v28 = vmax.f32 %v1611_v22, 0.0 }
 0x492   :  { %v3410_v19 = vpop.f32.mrf.mxu0 }
 0x493   :  { %v1614_v21 = vadd.f32 %v3410_v19, %v2936_v53  ;;  %3435 = vmatprep.mubr.bf16.mxu1 %v1668_v17  ;;  %v1641_v26 = vmax.f32 %v1603_v20, 0.0 }
 0x494   :  { %v1605_v58 = vpop.f32.mrf.mxu0  ;;  %3436 = vmatmul.mubr.bf16.gmra.mxu1 %v1669_v18 }
 0x495   :  { %v1606_v23 = vadd.f32 %v2936_v53, %v1605_v58  ;;  %v1644_v24 = vmax.f32 %v1614_v21, 0.0 }
 0x496   :  { %v3413_v25 = vpop.f32.mrf.mxu0 }
 0x497   :  { %v1642_v27 = vmax.f32 %v1606_v23, 0.0  ;;  %v1671_v31 = vpack.c.bf16 %v1644_v24, %v1643_v28  ;;  %v1627_v35 = vadd.f32 %v3413_v25, %v2936_v53 }
 0x498   :  { %v1618_v29 = vpop.f32.mrf.mxu0 }
 0x499   :  { %v1670_v30 = vpack.c.bf16 %v1642_v27, %v1641_v26  ;;  %v1619_v33 = vadd.f32 %v2936_v53, %v1618_v29  ;;  %v1647_v41 = vmax.f32 %v1627_v35, 0.0 }
 0x49a   :  { %v3414_v32 = vpop.f32.mrf.mxu0 }
 0x49b   :  { %v1630_v34 = vadd.f32 %v3414_v32, %v2936_v53  ;;  %3439 = vmatprep.mubr.bf16.mxu1 %v1670_v30  ;;  %v1645_v39 = vmax.f32 %v1619_v33, 0.0 }
 0x49c   :  { %v1621_v36 = vpop.f32.mrf.mxu0  ;;  %3440 = vmatmul.mubr.bf16.gmra.mxu1 %v1671_v31 }
 0x49d   :  { %v1622_v37 = vadd.f32 %v2936_v53, %v1621_v36  ;;  %v1648_v38 = vmax.f32 %v1630_v34, 0.0 }
 0x49f   :  { %v1646_v40 = vmax.f32 %v1622_v37, 0.0  ;;  %v1673_v43 = vpack.c.bf16 %v1648_v38, %v1647_v41 }
 0x4a1   :  { %v1672_v42 = vpack.c.bf16 %v1646_v40, %v1645_v39 }
 0x4a3   :  { %3443 = vmatprep.mubr.bf16.mxu1 %v1672_v42 }
 0x4a4   :  { %3444 = vmatmul.mubr.bf16.gmra.mxu1 %v1673_v43 }
 0x54c   :  { %v3433_v45 = vpop.f32.mrf.mxu1 }
 0x54d   :  { %v1773_v52 = vadd.f32 %v3433_v45, %v2961_v44 }
 0x54e   :  { %v1764_v46 = vpop.f32.mrf.mxu1 }
 0x54f   :  { %v1829_v47 = vmax.f32 %v1773_v52, 0.0  ;;  %v1765_v48 = vadd.f32 %v2961_v44, %v1764_v46 }
 0x550   :  { %v3434_v49 = vpop.f32.mrf.mxu1 }
 0x551   :  { %1845 = vst [vmem:[#allocation2 + $0x10] sm:$0xff] %v1829_v47  ;;  %v1827_v50 = vmax.f32 %v1765_v48, 0.0  ;;  %v1776_v54 = vadd.f32 %v3434_v49, %v2961_v44 }
 0x552   :  { %v1767_v55 = vpop.f32.mrf.mxu1 }
 0x553   :  { %1843 = vst [vmem:[#allocation2] sm:$0xff] %v1827_v50  ;;  %v1830_v53 = vmax.f32 %v1776_v54, 0.0  ;;  %v1768_v56 = vadd.f32 %v2961_v44, %v1767_v55 }
 0x554   :  { %v3437_v57 = vpop.f32.mrf.mxu1 }
 0x555   :  { %1846 = vst [vmem:[#allocation2 + $0x18] sm:$0xff] %v1830_v53  ;;  %v1828_v60 = vmax.f32 %v1768_v56, 0.0  ;;  %v1789_v61 = vadd.f32 %v3437_v57, %v2961_v44 }
 0x556   :  { %v1780_v59 = vpop.f32.mrf.mxu1 }
 0x557   :  { %1844 = vst [vmem:[#allocation2 + $0x8] sm:$0xff] %v1828_v60  ;;  %v1833_v62 = vmax.f32 %v1789_v61, 0.0  ;;  %v1781_v63 = vadd.f32 %v2961_v44, %v1780_v59 }
 0x558   :  { %v3438_v0 = vpop.f32.mrf.mxu1 }
 0x559   :  { %1849 = vst [vmem:[#allocation2 + $0x30] sm:$0xff] %v1833_v62  ;;  %v1831_v1 = vmax.f32 %v1781_v63, 0.0  ;;  %v1792_v2 = vadd.f32 %v3438_v0, %v2961_v44 }
 0x55a   :  { %v1783_v3 = vpop.f32.mrf.mxu1 }
 0x55b   :  { %1847 = vst [vmem:[#allocation2 + $0x20] sm:$0xff] %v1831_v1  ;;  %v1834_v4 = vmax.f32 %v1792_v2, 0.0  ;;  %v1784_v5 = vadd.f32 %v2961_v44, %v1783_v3 }
 0x55c   :  { %v3441_v6 = vpop.f32.mrf.mxu1 }
 0x55d   :  { %1850 = vst [vmem:[#allocation2 + $0x38] sm:$0xff] %v1834_v4  ;;  %v1832_v7 = vmax.f32 %v1784_v5, 0.0  ;;  %v1805_v8 = vadd.f32 %v3441_v6, %v2961_v44 }
 0x55e   :  { %v1796_v9 = vpop.f32.mrf.mxu1 }
 0x55f   :  { %1848 = vst [vmem:[#allocation2 + $0x28] sm:$0xff] %v1832_v7  ;;  %v1837_v10 = vmax.f32 %v1805_v8, 0.0  ;;  %v1797_v11 = vadd.f32 %v2961_v44, %v1796_v9 }
 0x560   :  { %v3442_v12 = vpop.f32.mrf.mxu1 }
 0x561   :  { %1853 = vst [vmem:[#allocation2 + $0x50] sm:$0xff] %v1837_v10  ;;  %v1835_v13 = vmax.f32 %v1797_v11, 0.0  ;;  %v1808_v14 = vadd.f32 %v3442_v12, %v2961_v44 }
 0x562   :  { %v1799_v15 = vpop.f32.mrf.mxu1 }
 0x563   :  { %1851 = vst [vmem:[#allocation2 + $0x40] sm:$0xff] %v1835_v13  ;;  %v1838_v16 = vmax.f32 %v1808_v14, 0.0  ;;  %v1800_v17 = vadd.f32 %v2961_v44, %v1799_v15 }
 0x564   :  { %v3445_v18 = vpop.f32.mrf.mxu1 }
 0x565   :  { %1854 = vst [vmem:[#allocation2 + $0x58] sm:$0xff] %v1838_v16  ;;  %v1836_v19 = vmax.f32 %v1800_v17, 0.0  ;;  %v1821_v20 = vadd.f32 %v3445_v18, %v2961_v44 }
 0x566   :  { %v1812_v21 = vpop.f32.mrf.mxu1 }
 0x567   :  { %1852 = vst [vmem:[#allocation2 + $0x48] sm:$0xff] %v1836_v19  ;;  %v1841_v22 = vmax.f32 %v1821_v20, 0.0  ;;  %v1813_v58 = vadd.f32 %v2961_v44, %v1812_v21 }
 0x568   :  { %v3446_v23 = vpop.f32.mrf.mxu1 }
 0x569   :  { %1857 = vst [vmem:[#allocation2 + $0x70] sm:$0xff] %v1841_v22  ;;  %v1839_v24 = vmax.f32 %v1813_v58, 0.0  ;;  %v1824_v25 = vadd.f32 %v3446_v23, %v2961_v44 }
 0x56a   :  { %v1815_v26 = vpop.f32.mrf.mxu1 }
 0x56b   :  { %1855 = vst [vmem:[#allocation2 + $0x60] sm:$0xff] %v1839_v24  ;;  %v1842_v27 = vmax.f32 %v1824_v25, 0.0  ;;  %v1816_v28 = vadd.f32 %v2961_v44, %v1815_v26 }
 0x56d   :  { %1858 = vst [vmem:[#allocation2 + $0x78] sm:$0xff] %v1842_v27  ;;  %v1840_v29 = vmax.f32 %v1816_v28, 0.0 }
 0x56f   :  { %1856 = vst [vmem:[#allocation2 + $0x68] sm:$0xff] %v1840_v29 }
 0x570 LB: > { %s1881_s1 = sld [smem:[#allocation10 + %s4011_s13]]  ;;  %s1885_s6 = scalar_lea.vmem [#allocation3], %s4011_s13  ;;  %s4011_s13 = sphi %s4009_s13, %s1880_s13  }
 0x571   : > { %s1882_s19 = sld [smem:[#allocation11 + %s4011_s13]]  ;;  %v1886_v30 = vld [vmem:[%s1885_s6] sm:$0x1]  ;;  %s1880_s13 = sadd.s32 1, %s4011_s13  }
 0x572   : > { %p1877_p11 = scmp.ge.s32.totalorder %s1880_s13, 256  }
 0x573   :  { %v3675_v36 = vld [vmem:[%s4741_s10 + $0xb8] sm:$0xff] (%p1877_p11)   ;;  %2329 = vst [vmem:[#allocation5] sm:$0xff] (%p1877_p11), %v4035_v51  ;;  %v3676_v37 = vld [vmem:[%s4741_s10 + $0xb0] sm:$0xff] (%p1877_p11)   ;;  %v3677_v38 = vld [vmem:[%s4741_s10 + $0xa8] sm:$0xff] (%p1877_p11)  }
 0x574   :  { %3447 = vmatprep.subr.bf16.mxu0 (%p1877_p11), %v3675_v36  ;;  %v3678_v39 = vld [vmem:[%s4741_s10 + $0xa0] sm:$0xff] (%p1877_p11)   ;;  %v1894_v41 = vld [vmem:[#allocation2 + $0x8] sm:$0xff] (%p1877_p11)  ;;  %v3679_v52 = vld [vmem:[%s4741_s10 + $0x98] sm:$0xff] (%p1877_p11)  }
 0x575   :  { %3448 = vmatpush3.bf16.msra.mxu0 (%p1877_p11), %v3675_v36  ;;  %v1893_v40 = vld [vmem:[#allocation2] sm:$0xff] (%p1877_p11)  ;;  %v3680_v47 = vld [vmem:[%s4741_s10 + $0x90] sm:$0xff] (%p1877_p11)   ;;  %v3681_v48 = vld [vmem:[%s4741_s10 + $0x88] sm:$0xff] (%p1877_p11)  }
 0x576   : > { %s1883_s15 = scalar_lea.vmem [#allocation2], %s1881_s1  ;;  %3449 = vmatprep.subr.bf16.mxu0 (%p1877_p11), %v3676_v37  ;;  %v3683_v49 = vld [vmem:[%s4743_s12 + $0xb8] sm:$0xff] (%p1877_p11)   ;;  %v3684_v50 = vld [vmem:[%s4743_s12 + $0xb0] sm:$0xff] (%p1877_p11)   ;;  %v3682_v57 = vld [vmem:[%s4741_s10 + $0x80] sm:$0xff] (%p1877_p11)  }
 0x577   : > { %v1884_v31 = vld [vmem:[%s1883_s15] sm:$0x1]  ;;  %s1889_s11 = scalar_lea.vmem [#allocation4], %s1882_s19  ;;  %v1895_v54 = vld [vmem:[#allocation2 + $0x10] sm:$0xff] (%p1877_p11)  ;;  %v1896_v55 = vld [vmem:[#allocation2 + $0x18] sm:$0xff] (%p1877_p11)  ;;  %3479 = vmatprep.subr.bf16.mxu1 (%p1877_p11), %v3683_v49 }
 0x578   : > { %v1887_v32 = vadd.f32 %v1886_v30, %v1884_v31  ;;  %v1890_v33 = vld [vmem:[%s1889_s11] sm:$0x1]  ;;  %v1898_v61 = vld [vmem:[#allocation2 + $0x28] sm:$0xff] (%p1877_p11)  ;;  %3480 = vmatpush3.bf16.msra.mxu1 (%p1877_p11), %v3683_v49  ;;  %v1899_v6 = vld [vmem:[#allocation2 + $0x30] sm:$0xff] (%p1877_p11) }
 0x579   :  { %3450 = vmatpush3.bf16.msra.mxu0 (%p1877_p11), %v3676_v37  ;;  %v1897_v60 = vld [vmem:[#allocation2 + $0x20] sm:$0xff] (%p1877_p11)  ;;  %3481 = vmatprep.subr.bf16.mxu1 (%p1877_p11), %v3684_v50  ;;  %v3685_v63 = vld [vmem:[%s4743_s12 + $0xa8] sm:$0xff] (%p1877_p11)   ;;  %v1900_v7 = vld [vmem:[#allocation2 + $0x38] sm:$0xff] (%p1877_p11) }
 0x57a   : > { %v1888_v34 = vmax.f32 %v1887_v32, 0.0  ;;  %1879 = sbr.rel (!%p1877_p11) target bundleno = 1392 (0x570), region = 233  ;;  %3451 = vmatprep.subr.bf16.mxu0 (%p1877_p11), %v3677_v38  ;;  %v3686_v4 = vld [vmem:[%s4743_s12 + $0xa0] sm:$0xff] (%p1877_p11)   ;;  %v3687_v12 = vld [vmem:[%s4743_s12 + $0x98] sm:$0xff] (%p1877_p11)   ;;  %v1902_v13 = vld [vmem:[#allocation2 + $0x48] sm:$0xff] (%p1877_p11) }
 0x57b   :  { %v1901_v11 = vld [vmem:[#allocation2 + $0x40] sm:$0xff] (%p1877_p11)  ;;  %v1903_v21 = vld [vmem:[#allocation2 + $0x50] sm:$0xff] (%p1877_p11)  ;;  %v1904_v22 = vld [vmem:[#allocation2 + $0x58] sm:$0xff] (%p1877_p11) }
 0x57c   : > { %v1891_v35 = vadd.f32 %v1890_v33, %v1888_v34  ;;  %3482 = vmatpush3.bf16.msra.mxu1 (%p1877_p11), %v3684_v50  ;;  %v1905_v25 = vld [vmem:[#allocation2 + $0x60] sm:$0xff] (%p1877_p11)  ;;  %v1906_v26 = vld [vmem:[#allocation2 + $0x68] sm:$0xff] (%p1877_p11)  ;;  %v1907_v34 = vld [vmem:[#allocation2 + $0x70] sm:$0xff] (%p1877_p11) }
 0x57d   :  { %3452 = vmatpush3.bf16.msra.mxu0 (%p1877_p11), %v3677_v38  ;;  %3483 = vmatprep.subr.bf16.mxu1 (%p1877_p11), %v3685_v63  ;;  %v1908_v36 = vld [vmem:[#allocation2 + $0x78] sm:$0xff] (%p1877_p11) }
 0x57e   : > { %1892 = vst [vmem:[%s1889_s11] sm:$0x1] %v1891_v35  ;;  %3453 = vmatprep.subr.bf16.mxu0 (%p1877_p11), %v3678_v39 }
 0x580   :  { %3484 = vmatpush3.bf16.msra.mxu1 %v3685_v63 }
 0x581   :  { %3454 = vmatpush3.bf16.msra.mxu0 %v3678_v39  ;;  %3485 = vmatprep.subr.bf16.mxu1 %v3686_v4 }
 0x582   :  { %3455 = vmatprep.subr.bf16.mxu0 %v3679_v52 }
 0x584   :  { %3486 = vmatpush3.bf16.msra.mxu1 %v3686_v4 }
 0x585   :  { %v1909_v42 = vld [vmem:[#allocation4] sm:$0xff]  ;;  %v1910_v43 = vld [vmem:[#allocation4 + $0x8] sm:$0xff]  ;;  %3456 = vmatpush3.bf16.msra.mxu0 %v3679_v52  ;;  %v1911_v53 = vld [vmem:[#allocation4 + $0x10] sm:$0xff]  ;;  %3487 = vmatprep.subr.bf16.mxu1 %v3687_v12 }
 0x586   :  { %v1925_v44 = vadd.f32 %v1909_v42, %v1893_v40  ;;  %v1926_v45 = vadd.f32 %v1910_v43, %v1894_v41  ;;  %3457 = vmatprep.subr.bf16.mxu0 %v3680_v47  ;;  %v1912_v56 = vld [vmem:[#allocation4 + $0x18] sm:$0xff]  ;;  %v1913_v59 = vld [vmem:[#allocation4 + $0x20] sm:$0xff]  ;;  %v1914_v62 = vld [vmem:[#allocation4 + $0x28] sm:$0xff]  ;;  %v1927_v0 = vadd.f32 %v1911_v53, %v1895_v54 }
 0x587   :  { %v1928_v1 = vadd.f32 %v1912_v56, %v1896_v55  ;;  %v1929_v2 = vadd.f32 %v1913_v59, %v1897_v60  ;;  %v1930_v3 = vadd.f32 %v1914_v62, %v1898_v61  ;;  %v1915_v8 = vld [vmem:[#allocation4 + $0x30] sm:$0xff]  ;;  %v1916_v10 = vld [vmem:[#allocation4 + $0x38] sm:$0xff]  ;;  %v1917_v14 = vld [vmem:[#allocation4 + $0x40] sm:$0xff] }
 0x588   :  { %v1958_v46 = vpack.c.bf16 %v1926_v45, %v1925_v44  ;;  %v1918_v15 = vld [vmem:[#allocation4 + $0x48] sm:$0xff]  ;;  %v1931_v16 = vadd.f32 %v1915_v8, %v1899_v6  ;;  %v1932_v17 = vadd.f32 %v1916_v10, %v1900_v7  ;;  %v1933_v18 = vadd.f32 %v1917_v14, %v1901_v11  ;;  %3488 = vmatpush3.bf16.msra.mxu1 %v3687_v12  ;;  %v1919_v23 = vld [vmem:[#allocation4 + $0x50] sm:$0xff]  ;;  %v1920_v24 = vld [vmem:[#allocation4 + $0x58] sm:$0xff] }
 0x589   :  { %3458 = vmatpush3.bf16.msra.mxu0 %v3680_v47  ;;  %v1959_v5 = vpack.c.bf16 %v1928_v1, %v1927_v0  ;;  %v1960_v9 = vpack.c.bf16 %v1930_v3, %v1929_v2  ;;  %v1934_v19 = vadd.f32 %v1918_v15, %v1902_v13  ;;  %v1921_v27 = vld [vmem:[#allocation4 + $0x60] sm:$0xff]  ;;  %v1922_v28 = vld [vmem:[#allocation4 + $0x68] sm:$0xff]  ;;  %v1935_v29 = vadd.f32 %v1919_v23, %v1903_v21  ;;  %v1923_v37 = vld [vmem:[#allocation4 + $0x70] sm:$0xff] }
 0x58a   :  { %3463 = vmatprep.mubr.bf16.mxu0 %v1958_v46  ;;  %3459 = vmatprep.subr.bf16.mxu0 %v3681_v48  ;;  %v1961_v20 = vpack.c.bf16 %v1932_v17, %v1931_v16  ;;  %v1936_v30 = vadd.f32 %v1920_v24, %v1904_v22  ;;  %v1937_v31 = vadd.f32 %v1921_v27, %v1905_v25  ;;  %v1924_v38 = vld [vmem:[#allocation4 + $0x78] sm:$0xff]  ;;  %v3688_v42 = vld [vmem:[%s4743_s12 + $0x90] sm:$0xff]   ;;  %v3689_v43 = vld [vmem:[%s4743_s12 + $0x88] sm:$0xff]  }
 0x58b   :  { %v1962_v58 = vpack.c.bf16 %v1934_v19, %v1933_v18  ;;  %v1938_v32 = vadd.f32 %v1922_v28, %v1906_v26  ;;  %v1939_v39 = vadd.f32 %v1923_v37, %v1907_v34  ;;  %v1940_v40 = vadd.f32 %v1924_v38, %v1908_v36  ;;  %3489 = vmatprep.subr.bf16.mxu1 %v3688_v42  ;;  %v3690_v44 = vld [vmem:[%s4743_s12 + $0x80] sm:$0xff]   ;;  %v2986_v46 = vld [vmem:[#allocation14 + $0x2] ss:$0 sm:$0xff]  ;;  %s4013_s12 = smov 0  }
 0x58c   :  { %v1963_v33 = vpack.c.bf16 %v1936_v30, %v1935_v29  ;;  %3490 = vmatpush3.bf16.msra.mxu1 %v3688_v42 }
 0x58d   :  { %3460 = vmatpush3.bf16.msra.mxu0 %v3681_v48  ;;  %v1964_v35 = vpack.c.bf16 %v1938_v32, %v1937_v31  ;;  %v1965_v41 = vpack.c.bf16 %v1940_v40, %v1939_v39  ;;  %3491 = vmatprep.subr.bf16.mxu1 %v3689_v43  ;;  %v3011_v39 = vld [vmem:[#allocation15 + $0x2] ss:$0 sm:$0xff] }
 0x58e   :  { %3461 = vmatprep.subr.bf16.mxu0 %v3682_v57 }
 0x590   :  { %3492 = vmatpush3.bf16.msra.mxu1 %v3689_v43 }
 0x591   :  { %3462 = vmatpush3.bf16.msra.mxu0 %v3682_v57  ;;  %3493 = vmatprep.subr.bf16.mxu1 %v3690_v44 }
 0x594   :  { %3464 = vmatmul.mubr.bf16.vlgmr.msra.gmra.mxu0 %v1959_v5  ;;  %3494 = vmatpush3.bf16.msra.mxu1 %v3690_v44 }
 0x595   :  { %3467 = vmatprep.mubr.bf16.mxu0 %v1960_v9 }
 0x59c   :  { %3468 = vmatmul.mubr.bf16.gmra.mxu0 %v1961_v20 }
 0x59d   :  { %3471 = vmatprep.mubr.bf16.mxu0 %v1962_v58 }
 0x5a4   :  { %3472 = vmatmul.mubr.bf16.gmra.mxu0 %v1963_v33 }
 0x5a5   :  { %3475 = vmatprep.mubr.bf16.mxu0 %v1964_v35 }
 0x5ac   :  { %3476 = vmatmul.mubr.bf16.gmra.mxu0 %v1965_v41 }
 0x654   :  { %v3465_v45 = vpop.f32.mrf.mxu0 }
 0x655   :  { %v2065_v50 = vadd.f32 %v3465_v45, %v2986_v46 }
 0x656   :  { %v2056_v52 = vpop.f32.mrf.mxu0 }
 0x657   :  { %v2057_v48 = vadd.f32 %v2986_v46, %v2056_v52  ;;  %v2121_v61 = vmax.f32 %v2065_v50, 0.0 }
 0x658   :  { %v3466_v47 = vpop.f32.mrf.mxu0 }
 0x659   :  { %v2068_v49 = vadd.f32 %v3466_v47, %v2986_v46  ;;  %v2119_v57 = vmax.f32 %v2057_v48, 0.0 }
 0x65a   :  { %v2059_v54 = vpop.f32.mrf.mxu0 }
 0x65b   :  { %v2060_v55 = vadd.f32 %v2986_v46, %v2059_v54  ;;  %v2122_v53 = vmax.f32 %v2068_v49, 0.0 }
 0x65c   :  { %v3469_v56 = vpop.f32.mrf.mxu0 }
 0x65d   :  { %v2120_v60 = vmax.f32 %v2060_v55, 0.0  ;;  %v2153_v63 = vpack.c.bf16 %v2122_v53, %v2121_v61  ;;  %v2081_v3 = vadd.f32 %v3469_v56, %v2986_v46 }
 0x65e   :  { %v2072_v59 = vpop.f32.mrf.mxu0 }
 0x65f   :  { %v2152_v62 = vpack.c.bf16 %v2120_v60, %v2119_v57  ;;  %v2073_v1 = vadd.f32 %v2986_v46, %v2072_v59  ;;  %v2125_v10 = vmax.f32 %v2081_v3, 0.0 }
 0x660   :  { %v3470_v0 = vpop.f32.mrf.mxu0 }
 0x661   :  { %v2084_v2 = vadd.f32 %v3470_v0, %v2986_v46  ;;  %3495 = vmatprep.mubr.bf16.mxu1 %v2152_v62  ;;  %v2123_v8 = vmax.f32 %v2073_v1, 0.0 }
 0x662   :  { %v2075_v4 = vpop.f32.mrf.mxu0  ;;  %3496 = vmatmul.mubr.bf16.vlgmr.msra.gmra.mxu1 %v2153_v63 }
 0x663   :  { %v2076_v5 = vadd.f32 %v2986_v46, %v2075_v4  ;;  %v2126_v6 = vmax.f32 %v2084_v2, 0.0 }
 0x664   :  { %v3473_v7 = vpop.f32.mrf.mxu0 }
 0x665   :  { %v2124_v9 = vmax.f32 %v2076_v5, 0.0  ;;  %v2155_v13 = vpack.c.bf16 %v2126_v6, %v2125_v10  ;;  %v2097_v17 = vadd.f32 %v3473_v7, %v2986_v46 }
 0x666   :  { %v2088_v11 = vpop.f32.mrf.mxu0 }
 0x667   :  { %v2154_v12 = vpack.c.bf16 %v2124_v9, %v2123_v8  ;;  %v2089_v15 = vadd.f32 %v2986_v46, %v2088_v11  ;;  %v2129_v23 = vmax.f32 %v2097_v17, 0.0 }
 0x668   :  { %v3474_v14 = vpop.f32.mrf.mxu0 }
 0x669   :  { %v2100_v16 = vadd.f32 %v3474_v14, %v2986_v46  ;;  %3499 = vmatprep.mubr.bf16.mxu1 %v2154_v12  ;;  %v2127_v22 = vmax.f32 %v2089_v15, 0.0 }
 0x66a   :  { %v2091_v18 = vpop.f32.mrf.mxu0  ;;  %3500 = vmatmul.mubr.bf16.gmra.mxu1 %v2155_v13 }
 0x66b   :  { %v2092_v19 = vadd.f32 %v2986_v46, %v2091_v18  ;;  %v2130_v20 = vmax.f32 %v2100_v16, 0.0 }
 0x66c   :  { %v3477_v21 = vpop.f32.mrf.mxu0 }
 0x66d   :  { %v2128_v58 = vmax.f32 %v2092_v19, 0.0  ;;  %v2157_v26 = vpack.c.bf16 %v2130_v20, %v2129_v23  ;;  %v2113_v30 = vadd.f32 %v3477_v21, %v2986_v46 }
 0x66e   :  { %v2104_v24 = vpop.f32.mrf.mxu0 }
 0x66f   :  { %v2156_v25 = vpack.c.bf16 %v2128_v58, %v2127_v22  ;;  %v2105_v28 = vadd.f32 %v2986_v46, %v2104_v24  ;;  %v2133_v36 = vmax.f32 %v2113_v30, 0.0 }
 0x670   :  { %v3478_v27 = vpop.f32.mrf.mxu0 }
 0x671   :  { %v2116_v29 = vadd.f32 %v3478_v27, %v2986_v46  ;;  %3503 = vmatprep.mubr.bf16.mxu1 %v2156_v25  ;;  %v2131_v34 = vmax.f32 %v2105_v28, 0.0 }
 0x672   :  { %v2107_v31 = vpop.f32.mrf.mxu0  ;;  %3504 = vmatmul.mubr.bf16.gmra.mxu1 %v2157_v26 }
 0x673   :  { %v2108_v32 = vadd.f32 %v2986_v46, %v2107_v31  ;;  %v2134_v33 = vmax.f32 %v2116_v29, 0.0 }
 0x675   :  { %v2132_v35 = vmax.f32 %v2108_v32, 0.0  ;;  %v2159_v38 = vpack.c.bf16 %v2134_v33, %v2133_v36 }
 0x677   :  { %v2158_v37 = vpack.c.bf16 %v2132_v35, %v2131_v34 }
 0x679   :  { %3507 = vmatprep.mubr.bf16.mxu1 %v2158_v37 }
 0x67a   :  { %3508 = vmatmul.mubr.bf16.gmra.mxu1 %v2159_v38 }
 0x722   :  { %v3497_v40 = vpop.f32.mrf.mxu1 }
 0x723   :  { %v2259_v41 = vadd.f32 %v3497_v40, %v3011_v39 }
 0x724   :  { %v2250_v42 = vpop.f32.mrf.mxu1 }
 0x725   :  { %2315 = vst [vmem:[#allocation2 + $0x10] sm:$0xff] %v2259_v41  ;;  %v2251_v43 = vadd.f32 %v3011_v39, %v2250_v42 }
 0x726   :  { %v3498_v44 = vpop.f32.mrf.mxu1 }
 0x727   :  { %2313 = vst [vmem:[#allocation2] sm:$0xff] %v2251_v43  ;;  %v2262_v45 = vadd.f32 %v3498_v44, %v3011_v39 }
 0x728   :  { %v2253_v52 = vpop.f32.mrf.mxu1 }
 0x729   :  { %2316 = vst [vmem:[#allocation2 + $0x18] sm:$0xff] %v2262_v45  ;;  %v2254_v46 = vadd.f32 %v3011_v39, %v2253_v52 }
 0x72a   :  { %v3501_v47 = vpop.f32.mrf.mxu1 }
 0x72b   :  { %2314 = vst [vmem:[#allocation2 + $0x8] sm:$0xff] %v2254_v46  ;;  %v2275_v48 = vadd.f32 %v3501_v47, %v3011_v39 }
 0x72c   :  { %v2266_v49 = vpop.f32.mrf.mxu1 }
 0x72d   :  { %2319 = vst [vmem:[#allocation2 + $0x30] sm:$0xff] %v2275_v48  ;;  %v2267_v50 = vadd.f32 %v3011_v39, %v2266_v49 }
 0x72e   :  { %v3502_v54 = vpop.f32.mrf.mxu1 }
 0x72f   :  { %2317 = vst [vmem:[#allocation2 + $0x20] sm:$0xff] %v2267_v50  ;;  %v2278_v55 = vadd.f32 %v3502_v54, %v3011_v39 }
 0x730   :  { %v2269_v53 = vpop.f32.mrf.mxu1 }
 0x731   :  { %2320 = vst [vmem:[#allocation2 + $0x38] sm:$0xff] %v2278_v55  ;;  %v2270_v56 = vadd.f32 %v3011_v39, %v2269_v53 }
 0x732   :  { %v3505_v57 = vpop.f32.mrf.mxu1 }
 0x733   :  { %2318 = vst [vmem:[#allocation2 + $0x28] sm:$0xff] %v2270_v56  ;;  %v2291_v60 = vadd.f32 %v3505_v57, %v3011_v39 }
 0x734   :  { %v2282_v61 = vpop.f32.mrf.mxu1 }
 0x735   :  { %2323 = vst [vmem:[#allocation2 + $0x50] sm:$0xff] %v2291_v60  ;;  %v2283_v59 = vadd.f32 %v3011_v39, %v2282_v61 }
 0x736   :  { %v3506_v62 = vpop.f32.mrf.mxu1 }
 0x737   :  { %2321 = vst [vmem:[#allocation2 + $0x40] sm:$0xff] %v2283_v59  ;;  %v2294_v63 = vadd.f32 %v3506_v62, %v3011_v39 }
 0x738   :  { %v2285_v0 = vpop.f32.mrf.mxu1 }
 0x739   :  { %2324 = vst [vmem:[#allocation2 + $0x58] sm:$0xff] %v2294_v63  ;;  %v2286_v1 = vadd.f32 %v3011_v39, %v2285_v0 }
 0x73a   :  { %v3509_v2 = vpop.f32.mrf.mxu1 }
 0x73b   :  { %2322 = vst [vmem:[#allocation2 + $0x48] sm:$0xff] %v2286_v1  ;;  %v2307_v3 = vadd.f32 %v3509_v2, %v3011_v39 }
 0x73c   :  { %v2298_v4 = vpop.f32.mrf.mxu1 }
 0x73d   :  { %2327 = vst [vmem:[#allocation2 + $0x70] sm:$0xff] %v2307_v3  ;;  %v2299_v5 = vadd.f32 %v3011_v39, %v2298_v4 }
 0x73e   :  { %v3510_v6 = vpop.f32.mrf.mxu1 }
 0x73f   :  { %2325 = vst [vmem:[#allocation2 + $0x60] sm:$0xff] %v2299_v5  ;;  %v2310_v7 = vadd.f32 %v3510_v6, %v3011_v39 }
 0x740   :  { %v2301_v8 = vpop.f32.mrf.mxu1 }
 0x741   :  { %2328 = vst [vmem:[#allocation2 + $0x78] sm:$0xff] %v2310_v7  ;;  %v2302_v9 = vadd.f32 %v3011_v39, %v2301_v8 }
 0x743   :  { %2326 = vst [vmem:[#allocation2 + $0x68] sm:$0xff] %v2302_v9 }
 0x744 LB: > { %s2336_s9 = sld [smem:[#allocation13 + %s4015_s12]]  ;;  %s2339_s2 = scalar_lea.vmem [#allocation2], %s4015_s12  ;;  %s4015_s12 = sphi %s4013_s12, %s2335_s12  }
 0x745   : > { %s2335_s12 = sadd.s32 1, %s4015_s12  }
 0x746   : > { %p2332_p12 = scmp.ge.s32.totalorder %s2335_s12, 128  }
 0x747   :  { %3511 = vmatprep.subr.bf16.mxu0 (%p2332_p12), %v4035_v51  ;;  %v3691_v13 = vld [vmem:[#allocation17 + $0x38] sm:$0xff] (%p2332_p12)   ;;  %3531 = vmatprep.subr.bf16.mxu1 (%p2332_p12), %v4035_v51  ;;  %vm4036_vm2 = vmmov (%p2332_p12), 0   ;;  %v3692_v14 = vld [vmem:[#allocation17 + $0x30] sm:$0xff] (%p2332_p12)   ;;  %v3693_v15 = vld [vmem:[#allocation17 + $0x28] sm:$0xff] (%p2332_p12)   ;;  %s2457_s24 = sld [smem:[#allocation6]] (%p2332_p12) }
 0x748   :  { %3527 = vmatprep.mubr.msk.bf16.mxu0 (%p2332_p12), %vm4036_vm2, %v4035_v51  ;;  %3547 = vmatprep.mubr.msk.bf16.mxu1 (%p2332_p12), %vm4036_vm2, %v4035_v51  ;;  %v3699_v16 = vld [vmem:[#allocation20 + $0x38] sm:$0xff] (%p2332_p12)   ;;  %v3700_v18 = vld [vmem:[#allocation20 + $0x30] sm:$0xff] (%p2332_p12)   ;;  %v3701_v20 = vld [vmem:[#allocation20 + $0x28] sm:$0xff] (%p2332_p12)   ;;  %s3038_s14 = sld [smem:[#allocation6 + $0x1]] (%p2332_p12) }
 0x749   :  { %3512 = vmatpush3.bf16.msra.mxu0 (%p2332_p12), %v3691_v13  ;;  %v3694_v17 = vld [vmem:[#allocation17 + $0x20] sm:$0xff] (%p2332_p12)   ;;  %3532 = vmatpush3.bf16.msra.mxu1 (%p2332_p12), %v3699_v16  ;;  %v3695_v19 = vld [vmem:[#allocation17 + $0x18] sm:$0xff] (%p2332_p12)   ;;  %v3696_v21 = vld [vmem:[#allocation17 + $0x10] sm:$0xff] (%p2332_p12)   ;;  %s3048_s28 = sld [smem:[#allocation6 + $0x2]] (%p2332_p12) }
 0x74a   : > { %v2340_v10 = vld [vmem:[%s2339_s2] sm:$0x1]  ;;  %s2337_s17 = scalar_lea.vmem [#allocation5], %s2336_s9  ;;  %2334 = sbr.rel (!%p2332_p12) target bundleno = 1860 (0x744), region = 244  ;;  %3513 = vmatprep.subr.bf16.mxu0 (%p2332_p12), %v4035_v51  ;;  %3533 = vmatprep.subr.bf16.mxu1 (%p2332_p12), %v4035_v51  ;;  %v3702_v22 = vld [vmem:[#allocation20 + $0x20] sm:$0xff] (%p2332_p12)   ;;  %v3703_v23 = vld [vmem:[#allocation20 + $0x18] sm:$0xff] (%p2332_p12)  }
 0x74b   : > { %v2338_v11 = vld [vmem:[%s2337_s17] sm:$0x1]  ;;  %v3697_v58 = vld [vmem:[#allocation17 + $0x8] sm:$0xff] (%p2332_p12)   ;;  %v3698_v24 = vld [vmem:[#allocation17] sm:$0xff] (%p2332_p12)  }
 0x74c   : > { %v2341_v12 = vadd.f32 %v2340_v10, %v2338_v11  ;;  %v3704_v26 = vld [vmem:[#allocation20 + $0x10] sm:$0xff] (%p2332_p12)   ;;  %v3705_v28 = vld [vmem:[#allocation20 + $0x8] sm:$0xff] (%p2332_p12)   ;;  %v3706_v29 = vld [vmem:[#allocation20] sm:$0xff] (%p2332_p12)  }
 0x74d   :  { %3514 = vmatpush3.bf16.msra.mxu0 (%p2332_p12), %v3692_v14  ;;  %3534 = vmatpush3.bf16.msra.mxu1 (%p2332_p12), %v3700_v18  ;;  %v3707_v30 = vld [vmem:[#allocation23 + $0x38] sm:$0xff] (%p2332_p12)   ;;  %v3708_v31 = vld [vmem:[#allocation23 + $0x30] sm:$0xff] (%p2332_p12)   ;;  %v3709_v32 = vld [vmem:[#allocation23 + $0x28] sm:$0xff] (%p2332_p12)   ;;  %v2458_v38 = vstv (%p2332_p12), %s2457_s24 }
 0x74e   : > { %2342 = vst [vmem:[%s2337_s17] sm:$0x1] %v2341_v12  ;;  %3515 = vmatprep.subr.bf16.mxu0 (%p2332_p12), %v4035_v51  ;;  %3535 = vmatprep.subr.bf16.mxu1 (%p2332_p12), %v4035_v51  ;;  %v3710_v33 = vld [vmem:[#allocation23 + $0x20] sm:$0xff] (%p2332_p12)   ;;  %v3711_v34 = vld [vmem:[#allocation23 + $0x18] sm:$0xff] (%p2332_p12)   ;;  %v3712_v35 = vld [vmem:[#allocation23 + $0x10] sm:$0xff] (%p2332_p12)   ;;  %v2575_v57 = vstv (%p2332_p12), %s3038_s14 }
 0x74f   :  { %v3020_v36 = vld [vmem:[#allocation18] ss:$0 sm:$0xff]  ;;  %v3713_v52 = vld [vmem:[#allocation23 + $0x8] sm:$0xff]   ;;  %v3714_v46 = vld [vmem:[#allocation23] sm:$0xff]   ;;  %v2692_v6 = vstv %s3048_s28 }
 0x750   :  { %v3715_v47 = vld [vmem:[#allocation26 + $0x38] sm:$0xff]   ;;  %v3716_v48 = vld [vmem:[#allocation26 + $0x30] sm:$0xff]   ;;  %v3717_v49 = vld [vmem:[#allocation26 + $0x28] sm:$0xff]  }
 0x751   :  { %3516 = vmatpush3.bf16.msra.mxu0 %v3693_v15  ;;  %3536 = vmatpush3.bf16.msra.mxu1 %v3701_v20  ;;  %v3718_v50 = vld [vmem:[#allocation26 + $0x20] sm:$0xff]   ;;  %v3719_v54 = vld [vmem:[#allocation26 + $0x18] sm:$0xff]   ;;  %v3720_v55 = vld [vmem:[#allocation26 + $0x10] sm:$0xff]  }
 0x752   :  { %3517 = vmatprep.subr.bf16.mxu0 %v4035_v51  ;;  %3537 = vmatprep.subr.bf16.mxu1 %v4035_v51  ;;  %v3029_v53 = vld [vmem:[#allocation21] ss:$0 sm:$0xff]  ;;  %v3721_v2 = vld [vmem:[#allocation26 + $0x8] sm:$0xff]   ;;  %v3722_v3 = vld [vmem:[#allocation26] sm:$0xff]  }
 0x753   :  { %v3039_v4 = vld [vmem:[#allocation24] ss:$0 sm:$0xff]  ;;  %v3049_v14 = vld [vmem:[#allocation27] ss:$0 sm:$0xff] }
 0x755   :  { %3518 = vmatpush3.bf16.msra.mxu0 %v3694_v17  ;;  %3538 = vmatpush3.bf16.msra.mxu1 %v3702_v22  ;;  %v2343_v25 = vld [vmem:[#allocation5] sm:$0xff] }
 0x756   :  { %3519 = vmatprep.subr.bf16.mxu0 %v4035_v51  ;;  %3539 = vmatprep.subr.bf16.mxu1 %v4035_v51  ;;  %v2360_v27 = vpack.c.bf16 %v2343_v25, %v2343_v25 }
 0x759   :  { %3520 = vmatpush3.bf16.msra.mxu0 %v3695_v19  ;;  %3540 = vmatpush3.bf16.msra.mxu1 %v3703_v23 }
 0x75a   :  { %3521 = vmatprep.subr.bf16.mxu0 %v4035_v51  ;;  %3541 = vmatprep.subr.bf16.mxu1 %v4035_v51 }
 0x75d   :  { %3522 = vmatpush3.bf16.msra.mxu0 %v3696_v21  ;;  %3542 = vmatpush3.bf16.msra.mxu1 %v3704_v26 }
 0x75e   :  { %3523 = vmatprep.subr.bf16.mxu0 %v4035_v51  ;;  %3543 = vmatprep.subr.bf16.mxu1 %v4035_v51 }
 0x761   :  { %3524 = vmatpush3.bf16.msra.mxu0 %v3697_v58  ;;  %3544 = vmatpush3.bf16.msra.mxu1 %v3705_v28 }
 0x762   :  { %3525 = vmatprep.subr.bf16.mxu0 %v4035_v51  ;;  %3545 = vmatprep.subr.bf16.mxu1 %v4035_v51 }
 0x765   :  { %3526 = vmatpush3.bf16.msra.mxu0 %v3698_v24  ;;  %3546 = vmatpush3.bf16.msra.mxu1 %v3706_v29 }
 0x766   :  { %3551 = vmatprep.subr.bf16.mxu0 %v4035_v51  ;;  %3571 = vmatprep.subr.bf16.mxu1 %v4035_v51 }
 0x768   :  { %3528 = vmatmul.mubr.bf16.vlgmr.msra.gmra.mxu0 %v2360_v27 }
 0x769   :  { %3567 = vmatprep.mubr.msk.bf16.mxu0 %vm4036_vm2, %v4035_v51  ;;  %3552 = vmatpush3.bf16.msra.mxu0 %v3707_v30 }
 0x76a   :  { %3553 = vmatprep.subr.bf16.mxu0 %v4035_v51 }
 0x76d   :  { %3554 = vmatpush3.bf16.msra.mxu0 %v3708_v31 }
 0x76e   :  { %3555 = vmatprep.subr.bf16.mxu0 %v4035_v51 }
 0x771   :  { %3556 = vmatpush3.bf16.msra.mxu0 %v3709_v32 }
 0x772   :  { %3557 = vmatprep.subr.bf16.mxu0 %v4035_v51 }
 0x775   :  { %3558 = vmatpush3.bf16.msra.mxu0 %v3710_v33 }
 0x776   :  { %3559 = vmatprep.subr.bf16.mxu0 %v4035_v51 }
 0x779   :  { %3560 = vmatpush3.bf16.msra.mxu0 %v3711_v34 }
 0x77a   :  { %3561 = vmatprep.subr.bf16.mxu0 %v4035_v51 }
 0x77d   :  { %3562 = vmatpush3.bf16.msra.mxu0 %v3712_v35 }
 0x77e   :  { %3563 = vmatprep.subr.bf16.mxu0 %v4035_v51 }
 0x781   :  { %3564 = vmatpush3.bf16.msra.mxu0 %v3713_v52 }
 0x782   :  { %3565 = vmatprep.subr.bf16.mxu0 %v4035_v51 }
 0x785   :  { %3566 = vmatpush3.bf16.msra.mxu0 %v3714_v46 }
 0x828   :  { %v2450_v37 = vpop.f32.mrf.mxu0 }
 0x829   :  { %v2451_v39 = vadd.f32 %v3020_v36, %v2450_v37 }
 0x82a   :  { %v3529_v40 = vpop.f32.mrf.mxu0 }
 0x82b   :  { %vm2456_vm3 = vcmp.gt.f32.partialorder %v2451_v39, 0.0  ;;  %v2459_v41 = vmul.f32 %v2458_v38, %v2451_v39 }
 0x82c   :  { %v2453_v42 = vpop.f32.mrf.mxu0 }
 0x82d   :  { %v2460_v43 = vsel %vm2456_vm3, %v2451_v39, %v2459_v41 }
 0x82e   :  { %v3530_v44 = vpop.f32.mrf.mxu0  ;;  %v2477_v45 = vpack.c.bf16 %v2460_v43, %v2460_v43 }
 0x830   :  { %3548 = vmatmul.mubr.bf16.vlgmr.msra.gmra.mxu1 %v2477_v45 }
 0x831   :  { %3587 = vmatprep.mubr.msk.bf16.mxu1 %vm4036_vm2, %v4035_v51  ;;  %3572 = vmatpush3.bf16.msra.mxu1 %v3715_v47 }
 0x832   :  { %3573 = vmatprep.subr.bf16.mxu1 %v4035_v51 }
 0x835   :  { %3574 = vmatpush3.bf16.msra.mxu1 %v3716_v48 }
 0x836   :  { %3575 = vmatprep.subr.bf16.mxu1 %v4035_v51 }
 0x839   :  { %3576 = vmatpush3.bf16.msra.mxu1 %v3717_v49 }
 0x83a   :  { %3577 = vmatprep.subr.bf16.mxu1 %v4035_v51 }
 0x83d   :  { %3578 = vmatpush3.bf16.msra.mxu1 %v3718_v50 }
 0x83e   :  { %3579 = vmatprep.subr.bf16.mxu1 %v4035_v51 }
 0x841   :  { %3580 = vmatpush3.bf16.msra.mxu1 %v3719_v54 }
 0x842   :  { %3581 = vmatprep.subr.bf16.mxu1 %v4035_v51 }
 0x845   :  { %3582 = vmatpush3.bf16.msra.mxu1 %v3720_v55 }
 0x846   :  { %3583 = vmatprep.subr.bf16.mxu1 %v4035_v51 }
 0x849   :  { %3584 = vmatpush3.bf16.msra.mxu1 %v3721_v2 }
 0x84a   :  { %3585 = vmatprep.subr.bf16.mxu1 %v4035_v51 }
 0x84d   :  { %3586 = vmatpush3.bf16.msra.mxu1 %v3722_v3 }
 0x8f0   :  { %v2567_v56 = vpop.f32.mrf.mxu1 }
 0x8f1   :  { %v2568_v60 = vadd.f32 %v3029_v53, %v2567_v56 }
 0x8f2   :  { %v3549_v61 = vpop.f32.mrf.mxu1 }
 0x8f3   :  { %vm2573_vm4 = vcmp.gt.f32.partialorder %v2568_v60, 0.0  ;;  %v2576_v59 = vmul.f32 %v2575_v57, %v2568_v60 }
 0x8f4   :  { %v2570_v62 = vpop.f32.mrf.mxu1 }
 0x8f5   :  { %v2577_v63 = vsel %vm2573_vm4, %v2568_v60, %v2576_v59 }
 0x8f6   :  { %v2594_v0 = vpack.c.bf16 %v2577_v63, %v2577_v63  ;;  %v3550_v1 = vpop.f32.mrf.mxu1 }
 0x8f8   :  { %3568 = vmatmul.mubr.bf16.vlgmr.msra.gmra.mxu0 %v2594_v0 }
 0x9b8   :  { %v2684_v5 = vpop.f32.mrf.mxu0 }
 0x9b9   :  { %v2685_v7 = vadd.f32 %v3039_v4, %v2684_v5 }
 0x9ba   :  { %v3569_v8 = vpop.f32.mrf.mxu0 }
 0x9bb   :  { %vm2690_vm5 = vcmp.gt.f32.partialorder %v2685_v7, 0.0  ;;  %v2693_v9 = vmul.f32 %v2692_v6, %v2685_v7 }
 0x9bc   :  { %v2687_v10 = vpop.f32.mrf.mxu0 }
 0x9bd   :  { %v2694_v11 = vsel %vm2690_vm5, %v2685_v7, %v2693_v9 }
 0x9be   :  { %v2711_v12 = vpack.c.bf16 %v2694_v11, %v2694_v11  ;;  %v3570_v13 = vpop.f32.mrf.mxu0 }
 0x9c0   :  { %3588 = vmatmul.mubr.bf16.vlgmr.msra.gmra.mxu1 %v2711_v12 }
 0xa80   :  { %v2801_v15 = vpop.f32.mrf.mxu1 }
 0xa81   :  { %v2802_v16 = vadd.f32 %v3049_v14, %v2801_v15 }
 0xa82   :  { %v3589_v17 = vpop.f32.mrf.mxu1 }
 0xa83   :  { %2807 = vst [vmem:[%s4753_s22] sm:$0xff] %v2802_v16 }
 0xa84   :  { %v2804_v51 = vpop.f32.mrf.mxu1 }
 0xa86   :  { %v3590_v18 = vpop.f32.mrf.mxu1 }
 0xa87   :  { %2812 = vsyncpa [#allocation7], 1 }
 0xa88   :  { %2813 = vsyncpa [#allocation16], 1 }
 0xa89   :  { %2814 = vsyncpa [#allocation19], 1 }
 0xa8a   :  { %2815 = vsyncpa [#allocation22], 1 }
 0xa8b   :  { %2816 = vsyncpa [#allocation25], 1 }
 0xa8c   :  { %2817 = vsyncpa [#allocation28], 1 }
 0xa8d   :  { %2818 = vsyncpa [#allocation8], 1 }
 0xa8e   :  { %2819 = vsyncpa [#allocation9], 1 }
 0xa8f   :  { %2820 = vsyncpa [#allocation12], 1 }

</bundles_post_ra>
